<compile_context>
chip_gen: v6e
topology: v6e:2x2x1
jax: 0.10.0
libtpu: 0.0.40
codegen_flags: <defaults>
</compile_context>

<pallas_src>
import math
import jax
import jax.numpy as jnp
from jax.experimental import pallas as pl
from jax.experimental.pallas import tpu as pltpu


# ------------------------------ Pallas kernel -------------------------------

def _make_fused_lstm_kernel(num_layers, L, N, H, O):
    """Fused stacked-LSTM + fc kernel factory.

    Ref order (all full-array VMEM blocks):
      x2d (L*N, F),
      [wih_l (I_l, 4H), whh_l (H, 4H), b_l (1, 4H)] * num_layers,
      wfc (H, O), bfc (1, O), out (L, O)
    where row t*N + n of x2d is the input at time t for LSTM-batch element n.
    """

    def kernel(*refs):
        x2d_ref = refs[0]
        layer_refs = refs[1:1 + 3 * num_layers]
        wfc_ref, bfc_ref, out_ref = refs[1 + 3 * num_layers:]

        # Load all weights once; everything below is fully unrolled (small static L).
        wih = [layer_refs[3 * l][...] for l in range(num_layers)]
        whh = [layer_refs[3 * l + 1][...] for l in range(num_layers)]
        bias = [layer_refs[3 * l + 2][...] for l in range(num_layers)]

        # Hoist layer-0 input projection out of the recurrence:
        # one (L*N, F) x (F, 4H) matmul instead of L tiny ones on the critical path.
        xg0 = jnp.dot(x2d_ref[...], wih[0],
                      preferred_element_type=jnp.float32)          # (L*N, 4H)

        h = [jnp.zeros((N, H), jnp.float32) for _ in range(num_layers)]
        c = [jnp.zeros((N, H), jnp.float32) for _ in range(num_layers)]

        top_rows = []
        for t in range(L):                        # static, fully unrolled time loop
            layer_in = None
            for l in range(num_layers):
                if l == 0:
                    gates = xg0[t * N:(t + 1) * N, :]               # precomputed x@Wih
                else:
                    gates = jnp.dot(layer_in, wih[l],
                                    preferred_element_type=jnp.float32)
                gates = gates + jnp.dot(h[l], whh[l],
                                        preferred_element_type=jnp.float32) + bias[l]
                # PyTorch gate order: i, f, g, o
                i_g = jax.nn.sigmoid(gates[:, 0:H])
                f_g = jax.nn.sigmoid(gates[:, H:2 * H])
                g_g = jnp.tanh(gates[:, 2 * H:3 * H])
                o_g = jax.nn.sigmoid(gates[:, 3 * H:4 * H])
                c[l] = f_g * c[l] + i_g * g_g
                h[l] = o_g * jnp.tanh(c[l])
                layer_in = h[l]
            # fc only consumes y[-1]: the LAST batch element's top-layer sequence.
            top_rows.append(h[num_layers - 1][N - 1:N, :])          # (1, H)

        yseq = jnp.concatenate(top_rows, axis=0)                    # (L, H)
        out = jnp.dot(yseq, wfc_ref[...],
                      preferred_element_type=jnp.float32) + bfc_ref[...]
        out_ref[...] = out.astype(out_ref.dtype)

    return kernel


# ------------------------------- JAX wrapper ---------------------------------

def lstm_forward(params, x):
    """x: (D0, D1, F), exactly as handed to the PyTorch module's forward().
    Returns fc(lstm(x.transpose(0,1))[-1]) of shape (D0, output_dim)."""
    D0, D1, F = x.shape
    # After the module's transpose(0,1), the batch_first LSTM sees batch = D1, seq = D0.
    # Time-major layout for the kernel is therefore the ORIGINAL x: (L, N, F) = (D0, D1, F).
    L, N = D0, D1
    lstm_params = params["lstm"]
    num_layers = len(lstm_params)
    H = lstm_params[0][1].shape[1]            # w_hh: (4H, H)
    O = params["fc_w"].shape[0]

    operands = [x.reshape(L * N, F)]          # row t*N + n == x[t, n]
    in_specs = [pl.BlockSpec((L * N, F), lambda i: (0, 0))]

    for (w_ih, w_hh, b_ih, b_hh) in lstm_params:
        wih_t = jnp.transpose(w_ih)           # (I_l, 4H)
        whh_t = jnp.transpose(w_hh)           # (H, 4H)
        b = (b_ih + b_hh).reshape(1, 4 * H)   # combined bias
        operands += [wih_t, whh_t, b]
        in_specs += [pl.BlockSpec(wih_t.shape, lambda i: (0, 0)),
                     pl.BlockSpec(whh_t.shape, lambda i: (0, 0)),
                     pl.BlockSpec(b.shape, lambda i: (0, 0))]

    wfc_t = jnp.transpose(params["fc_w"])     # (H, O)
    bfc = params["fc_b"].reshape(1, O)
    operands += [wfc_t, bfc]
    in_specs += [pl.BlockSpec(wfc_t.shape, lambda i: (0, 0)),
                 pl.BlockSpec(bfc.shape, lambda i: (0, 0))]

    kernel = _make_fused_lstm_kernel(num_layers, L, N, H, O)

    return pl.pallas_call(
        kernel,
        out_shape=jax.ShapeDtypeStruct((L, O), jnp.float32),
        grid=(1,),
        in_specs=in_specs,
        out_specs=pl.BlockSpec((L, O), lambda i: (0, 0)),
        compiler_params=pltpu.CompilerParams(dimension_semantics=("arbitrary",)),
    )(*operands)


# -------------------------------- Param init ---------------------------------

def init_params(key, input_size, hidden_size, output_dim, num_layers, seq_len=1,
                bidirectional=False):
    assert not bidirectional, "only the default bidirectional=False path is implemented"
    num_directions = 1
    fc_in = seq_len * hidden_size * num_directions
    # The literal forward (fc applied to y[-1]) only type-checks when
    # fc_in == hidden_size * num_directions, i.e. seq_len == 1.
    assert fc_in == hidden_size * num_directions

    k = 1.0 / math.sqrt(hidden_size)
    keys = jax.random.split(key, num_layers + 1)
    lstm = []
    for l in range(num_layers):
        in_l = input_size if l == 0 else hidden_size * num_directions
        ks = jax.random.split(keys[l], 4)
        w_ih = jax.random.uniform(ks[0], (4 * hidden_size, in_l), jnp.float32, -k, k)
        w_hh = jax.random.uniform(ks[1], (4 * hidden_size, hidden_size), jnp.float32, -k, k)
        b_ih = jax.random.uniform(ks[2], (4 * hidden_size,), jnp.float32, -k, k)
        b_hh = jax.random.uniform(ks[3], (4 * hidden_size,), jnp.float32, -k, k)
        lstm.append((w_ih, w_hh, b_ih, b_hh))

    kf = 1.0 / math.sqrt(fc_in)
    kw, kb = jax.random.split(keys[-1])
    fc_w = jax.random.uniform(kw, (output_dim, fc_in), jnp.float32, -kf, kf)
    fc_b = jax.random.uniform(kb, (output_dim,), jnp.float32, -kf, kf)
    return {"lstm": lstm, "fc_w": fc_w, "fc_b": fc_b}


# ----------------------------------- Main ------------------------------------

if __name__ == "__main__":
    input_size = 4
    hidden_size = 32
    output_dim = 4
    num_layers = 2
    seq_len_param = 1      # the literal forward requires fc.in_features == hidden_size
    D0, D1 = 8, 2          # x given to forward(); LSTM then runs seq=D0=8, batch=D1=2

    key = jax.random.PRNGKey(0)
    k_params, k_x = jax.random.split(key)
    params = init_params(k_params, input_size, hidden_size, output_dim, num_layers,
                         seq_len=seq_len_param)
    x = jax.random.normal(k_x, (D0, D1, input_size), jnp.float32)

    fwd = jax.jit(lstm_forward)
    out = fwd(params, x)
    jax.block_until_ready(out)
    assert out.shape == (D0, output_dim), out.shape
    assert bool(jnp.all(jnp.isfinite(out)))
    print("KERNEL_OK")
</pallas_src>

<mosaic_0001>
module attributes {stable_mosaic.version = 11 : i64} {
  func.func @kernel(%arg0: i32, %arg1: memref<16x4xf32, #tpu.memory_space<vmem>>, %arg2: memref<4x128xf32, #tpu.memory_space<vmem>>, %arg3: memref<32x128xf32, #tpu.memory_space<vmem>>, %arg4: memref<1x128xf32, #tpu.memory_space<vmem>>, %arg5: memref<32x128xf32, #tpu.memory_space<vmem>>, %arg6: memref<32x128xf32, #tpu.memory_space<vmem>>, %arg7: memref<1x128xf32, #tpu.memory_space<vmem>>, %arg8: memref<32x4xf32, #tpu.memory_space<vmem>>, %arg9: memref<1x4xf32, #tpu.memory_space<vmem>>, %arg10: memref<8x4xf32, #tpu.memory_space<vmem>>) attributes {dimension_semantics = [#tpu.dimension_semantics<arbitrary>], iteration_bounds = array<i64: 1>, scalar_prefetch = 0 : i64, scratch_operands = 0 : i64, tpu.core_type = #tpu.core_type<tc>, window_params = [{pipeline_mode = #tpu.pipeline_mode<synchronous>, transform_indices = @transform_0, window_bounds = array<i64: 16, 4>}, {pipeline_mode = #tpu.pipeline_mode<synchronous>, transform_indices = @transform_1, window_bounds = array<i64: 4, 128>}, {pipeline_mode = #tpu.pipeline_mode<synchronous>, transform_indices = @transform_2, window_bounds = array<i64: 32, 128>}, {pipeline_mode = #tpu.pipeline_mode<synchronous>, transform_indices = @transform_3, window_bounds = array<i64: 1, 128>}, {pipeline_mode = #tpu.pipeline_mode<synchronous>, transform_indices = @transform_4, window_bounds = array<i64: 32, 128>}, {pipeline_mode = #tpu.pipeline_mode<synchronous>, transform_indices = @transform_5, window_bounds = array<i64: 32, 128>}, {pipeline_mode = #tpu.pipeline_mode<synchronous>, transform_indices = @transform_6, window_bounds = array<i64: 1, 128>}, {pipeline_mode = #tpu.pipeline_mode<synchronous>, transform_indices = @transform_7, window_bounds = array<i64: 32, 4>}, {pipeline_mode = #tpu.pipeline_mode<synchronous>, transform_indices = @transform_8, window_bounds = array<i64: 1, 4>}, {pipeline_mode = #tpu.pipeline_mode<synchronous>, transform_indices = @transform_9, window_bounds = array<i64: 8, 4>}]} {
    %c0 = arith.constant 0 : index
    %c0_0 = arith.constant 0 : index
    %0 = vector.load %arg2[%c0, %c0_0] : memref<4x128xf32, #tpu.memory_space<vmem>>, vector<4x128xf32>
    %c0_1 = arith.constant 0 : index
    %c0_2 = arith.constant 0 : index
    %1 = vector.load %arg5[%c0_1, %c0_2] : memref<32x128xf32, #tpu.memory_space<vmem>>, vector<32x128xf32>
    %c0_3 = arith.constant 0 : index
    %c0_4 = arith.constant 0 : index
    %2 = vector.load %arg3[%c0_3, %c0_4] : memref<32x128xf32, #tpu.memory_space<vmem>>, vector<32x128xf32>
    %c0_5 = arith.constant 0 : index
    %c0_6 = arith.constant 0 : index
    %3 = vector.load %arg6[%c0_5, %c0_6] : memref<32x128xf32, #tpu.memory_space<vmem>>, vector<32x128xf32>
    %c0_7 = arith.constant 0 : index
    %c0_8 = arith.constant 0 : index
    %4 = vector.load %arg4[%c0_7, %c0_8] : memref<1x128xf32, #tpu.memory_space<vmem>>, vector<1x128xf32>
    %c0_9 = arith.constant 0 : index
    %c0_10 = arith.constant 0 : index
    %5 = vector.load %arg7[%c0_9, %c0_10] : memref<1x128xf32, #tpu.memory_space<vmem>>, vector<1x128xf32>
    %c0_11 = arith.constant 0 : index
    %c0_12 = arith.constant 0 : index
    %6 = vector.load %arg1[%c0_11, %c0_12] : memref<16x4xf32, #tpu.memory_space<vmem>>, vector<16x4xf32>
    %cst = arith.constant dense<0.000000e+00> : vector<16x128xf32>
    %7 = tpu.matmul %6, %0, %cst {dimension_numbers = #tpu.dot_dimension_numbers<[1], [0], [0], [1], [0, 0, 1, 1], [], []>} : vector<16x4xf32>, vector<4x128xf32>, vector<16x128xf32> -> vector<16x128xf32>
    %cst_13 = arith.constant 0.000000e+00 : f32
    %8 = vector.broadcast %cst_13 : f32 to vector<2x32xf32>
    %cst_14 = arith.constant 0.000000e+00 : f32
    %9 = vector.broadcast %cst_14 : f32 to vector<2x32xf32>
    %cst_15 = arith.constant 0.000000e+00 : f32
    %10 = vector.broadcast %cst_15 : f32 to vector<2x32xf32>
    %cst_16 = arith.constant 0.000000e+00 : f32
    %11 = vector.broadcast %cst_16 : f32 to vector<2x32xf32>
    %12 = vector.extract_strided_slice %7 {offsets = [0, 0], sizes = [2, 128], strides = [1, 1]} : vector<16x128xf32> to vector<2x128xf32>
    %cst_17 = arith.constant dense<0.000000e+00> : vector<2x128xf32>
    %13 = tpu.matmul %8, %2, %cst_17 {dimension_numbers = #tpu.dot_dimension_numbers<[1], [0], [0], [1], [0, 0, 1, 1], [], []>} : vector<2x32xf32>, vector<32x128xf32>, vector<2x128xf32> -> vector<2x128xf32>
    %14 = arith.addf %12, %13 : vector<2x128xf32>
    %15 = vector.broadcast %4 : vector<1x128xf32> to vector<2x128xf32>
    %16 = arith.addf %14, %15 : vector<2x128xf32>
    %17 = vector.extract_strided_slice %16 {offsets = [0, 0], sizes = [2, 32], strides = [1, 1]} : vector<2x128xf32> to vector<2x32xf32>
    %18 = arith.negf %17 : vector<2x32xf32>
    %19 = math.exp %18 : vector<2x32xf32>
    %cst_18 = arith.constant 1.000000e+00 : f32
    %20 = vector.broadcast %cst_18 : f32 to vector<2x32xf32>
    %21 = arith.addf %20, %19 : vector<2x32xf32>
    %22 = arith.divf %20, %21 : vector<2x32xf32>
    %23 = vector.extract_strided_slice %16 {offsets = [0, 32], sizes = [2, 32], strides = [1, 1]} : vector<2x128xf32> to vector<2x32xf32>
    %24 = arith.negf %23 : vector<2x32xf32>
    %25 = math.exp %24 : vector<2x32xf32>
    %cst_19 = arith.constant 1.000000e+00 : f32
    %26 = vector.broadcast %cst_19 : f32 to vector<2x32xf32>
    %27 = arith.addf %26, %25 : vector<2x32xf32>
    %28 = arith.divf %26, %27 : vector<2x32xf32>
    %29 = vector.extract_strided_slice %16 {offsets = [0, 64], sizes = [2, 32], strides = [1, 1]} : vector<2x128xf32> to vector<2x32xf32>
    %30 = math.tanh %29 : vector<2x32xf32>
    %31 = vector.extract_strided_slice %16 {offsets = [0, 96], sizes = [2, 32], strides = [1, 1]} : vector<2x128xf32> to vector<2x32xf32>
    %32 = arith.negf %31 : vector<2x32xf32>
    %33 = math.exp %32 : vector<2x32xf32>
    %cst_20 = arith.constant 1.000000e+00 : f32
    %34 = vector.broadcast %cst_20 : f32 to vector<2x32xf32>
    %35 = arith.addf %34, %33 : vector<2x32xf32>
    %36 = arith.divf %34, %35 : vector<2x32xf32>
    %37 = arith.mulf %28, %10 : vector<2x32xf32>
    %38 = arith.mulf %22, %30 : vector<2x32xf32>
    %39 = arith.addf %37, %38 : vector<2x32xf32>
    %40 = math.tanh %39 : vector<2x32xf32>
    %41 = arith.mulf %36, %40 : vector<2x32xf32>
    %cst_21 = arith.constant dense<0.000000e+00> : vector<2x128xf32>
    %42 = tpu.matmul %41, %1, %cst_21 {dimension_numbers = #tpu.dot_dimension_numbers<[1], [0], [0], [1], [0, 0, 1, 1], [], []>} : vector<2x32xf32>, vector<32x128xf32>, vector<2x128xf32> -> vector<2x128xf32>
    %cst_22 = arith.constant dense<0.000000e+00> : vector<2x128xf32>
    %43 = tpu.matmul %9, %3, %cst_22 {dimension_numbers = #tpu.dot_dimension_numbers<[1], [0], [0], [1], [0, 0, 1, 1], [], []>} : vector<2x32xf32>, vector<32x128xf32>, vector<2x128xf32> -> vector<2x128xf32>
    %44 = arith.addf %42, %43 : vector<2x128xf32>
    %45 = vector.broadcast %5 : vector<1x128xf32> to vector<2x128xf32>
    %46 = arith.addf %44, %45 : vector<2x128xf32>
    %47 = vector.extract_strided_slice %46 {offsets = [0, 0], sizes = [2, 32], strides = [1, 1]} : vector<2x128xf32> to vector<2x32xf32>
    %48 = arith.negf %47 : vector<2x32xf32>
    %49 = math.exp %48 : vector<2x32xf32>
    %cst_23 = arith.constant 1.000000e+00 : f32
    %50 = vector.broadcast %cst_23 : f32 to vector<2x32xf32>
    %51 = arith.addf %50, %49 : vector<2x32xf32>
    %52 = arith.divf %50, %51 : vector<2x32xf32>
    %53 = vector.extract_strided_slice %46 {offsets = [0, 32], sizes = [2, 32], strides = [1, 1]} : vector<2x128xf32> to vector<2x32xf32>
    %54 = arith.negf %53 : vector<2x32xf32>
    %55 = math.exp %54 : vector<2x32xf32>
    %cst_24 = arith.constant 1.000000e+00 : f32
    %56 = vector.broadcast %cst_24 : f32 to vector<2x32xf32>
    %57 = arith.addf %56, %55 : vector<2x32xf32>
    %58 = arith.divf %56, %57 : vector<2x32xf32>
    %59 = vector.extract_strided_slice %46 {offsets = [0, 64], sizes = [2, 32], strides = [1, 1]} : vector<2x128xf32> to vector<2x32xf32>
    %60 = math.tanh %59 : vector<2x32xf32>
    %61 = vector.extract_strided_slice %46 {offsets = [0, 96], sizes = [2, 32], strides = [1, 1]} : vector<2x128xf32> to vector<2x32xf32>
    %62 = arith.negf %61 : vector<2x32xf32>
    %63 = math.exp %62 : vector<2x32xf32>
    %cst_25 = arith.constant 1.000000e+00 : f32
    %64 = vector.broadcast %cst_25 : f32 to vector<2x32xf32>
    %65 = arith.addf %64, %63 : vector<2x32xf32>
    %66 = arith.divf %64, %65 : vector<2x32xf32>
    %67 = arith.mulf %58, %11 : vector<2x32xf32>
    %68 = arith.mulf %52, %60 : vector<2x32xf32>
    %69 = arith.addf %67, %68 : vector<2x32xf32>
    %70 = math.tanh %69 : vector<2x32xf32>
    %71 = arith.mulf %66, %70 : vector<2x32xf32>
    %72 = vector.extract_strided_slice %71 {offsets = [1, 0], sizes = [1, 32], strides = [1, 1]} : vector<2x32xf32> to vector<1x32xf32>
    %73 = vector.extract_strided_slice %7 {offsets = [2, 0], sizes = [2, 128], strides = [1, 1]} : vector<16x128xf32> to vector<2x128xf32>
    %cst_26 = arith.constant dense<0.000000e+00> : vector<2x128xf32>
    %74 = tpu.matmul %41, %2, %cst_26 {dimension_numbers = #tpu.dot_dimension_numbers<[1], [0], [0], [1], [0, 0, 1, 1], [], []>} : vector<2x32xf32>, vector<32x128xf32>, vector<2x128xf32> -> vector<2x128xf32>
    %75 = arith.addf %73, %74 : vector<2x128xf32>
    %76 = vector.broadcast %4 : vector<1x128xf32> to vector<2x128xf32>
    %77 = arith.addf %75, %76 : vector<2x128xf32>
    %78 = vector.extract_strided_slice %77 {offsets = [0, 0], sizes = [2, 32], strides = [1, 1]} : vector<2x128xf32> to vector<2x32xf32>
    %79 = arith.negf %78 : vector<2x32xf32>
    %80 = math.exp %79 : vector<2x32xf32>
    %cst_27 = arith.constant 1.000000e+00 : f32
    %81 = vector.broadcast %cst_27 : f32 to vector<2x32xf32>
    %82 = arith.addf %81, %80 : vector<2x32xf32>
    %83 = arith.divf %81, %82 : vector<2x32xf32>
    %84 = vector.extract_strided_slice %77 {offsets = [0, 32], sizes = [2, 32], strides = [1, 1]} : vector<2x128xf32> to vector<2x32xf32>
    %85 = arith.negf %84 : vector<2x32xf32>
    %86 = math.exp %85 : vector<2x32xf32>
    %cst_28 = arith.constant 1.000000e+00 : f32
    %87 = vector.broadcast %cst_28 : f32 to vector<2x32xf32>
    %88 = arith.addf %87, %86 : vector<2x32xf32>
    %89 = arith.divf %87, %88 : vector<2x32xf32>
    %90 = vector.extract_strided_slice %77 {offsets = [0, 64], sizes = [2, 32], strides = [1, 1]} : vector<2x128xf32> to vector<2x32xf32>
    %91 = math.tanh %90 : vector<2x32xf32>
    %92 = vector.extract_strided_slice %77 {offsets = [0, 96], sizes = [2, 32], strides = [1, 1]} : vector<2x128xf32> to vector<2x32xf32>
    %93 = arith.negf %92 : vector<2x32xf32>
    %94 = math.exp %93 : vector<2x32xf32>
    %cst_29 = arith.constant 1.000000e+00 : f32
    %95 = vector.broadcast %cst_29 : f32 to vector<2x32xf32>
    %96 = arith.addf %95, %94 : vector<2x32xf32>
    %97 = arith.divf %95, %96 : vector<2x32xf32>
    %98 = arith.mulf %89, %39 : vector<2x32xf32>
    %99 = arith.mulf %83, %91 : vector<2x32xf32>
    %100 = arith.addf %98, %99 : vector<2x32xf32>
    %101 = math.tanh %100 : vector<2x32xf32>
    %102 = arith.mulf %97, %101 : vector<2x32xf32>
    %cst_30 = arith.constant dense<0.000000e+00> : vector<2x128xf32>
    %103 = tpu.matmul %102, %1, %cst_30 {dimension_numbers = #tpu.dot_dimension_numbers<[1], [0], [0], [1], [0, 0, 1, 1], [], []>} : vector<2x32xf32>, vector<32x128xf32>, vector<2x128xf32> -> vector<2x128xf32>
    %cst_31 = arith.constant dense<0.000000e+00> : vector<2x128xf32>
    %104 = tpu.matmul %71, %3, %cst_31 {dimension_numbers = #tpu.dot_dimension_numbers<[1], [0], [0], [1], [0, 0, 1, 1], [], []>} : vector<2x32xf32>, vector<32x128xf32>, vector<2x128xf32> -> vector<2x128xf32>
    %105 = arith.addf %103, %104 : vector<2x128xf32>
    %106 = vector.broadcast %5 : vector<1x128xf32> to vector<2x128xf32>
    %107 = arith.addf %105, %106 : vector<2x128xf32>
    %108 = vector.extract_strided_slice %107 {offsets = [0, 0], sizes = [2, 32], strides = [1, 1]} : vector<2x128xf32> to vector<2x32xf32>
    %109 = arith.negf %108 : vector<2x32xf32>
    %110 = math.exp %109 : vector<2x32xf32>
    %cst_32 = arith.constant 1.000000e+00 : f32
    %111 = vector.broadcast %cst_32 : f32 to vector<2x32xf32>
    %112 = arith.addf %111, %110 : vector<2x32xf32>
    %113 = arith.divf %111, %112 : vector<2x32xf32>
    %114 = vector.extract_strided_slice %107 {offsets = [0, 32], sizes = [2, 32], strides = [1, 1]} : vector<2x128xf32> to vector<2x32xf32>
    %115 = arith.negf %114 : vector<2x32xf32>
    %116 = math.exp %115 : vector<2x32xf32>
    %cst_33 = arith.constant 1.000000e+00 : f32
    %117 = vector.broadcast %cst_33 : f32 to vector<2x32xf32>
    %118 = arith.addf %117, %116 : vector<2x32xf32>
    %119 = arith.divf %117, %118 : vector<2x32xf32>
    %120 = vector.extract_strided_slice %107 {offsets = [0, 64], sizes = [2, 32], strides = [1, 1]} : vector<2x128xf32> to vector<2x32xf32>
    %121 = math.tanh %120 : vector<2x32xf32>
    %122 = vector.extract_strided_slice %107 {offsets = [0, 96], sizes = [2, 32], strides = [1, 1]} : vector<2x128xf32> to vector<2x32xf32>
    %123 = arith.negf %122 : vector<2x32xf32>
    %124 = math.exp %123 : vector<2x32xf32>
    %cst_34 = arith.constant 1.000000e+00 : f32
    %125 = vector.broadcast %cst_34 : f32 to vector<2x32xf32>
    %126 = arith.addf %125, %124 : vector<2x32xf32>
    %127 = arith.divf %125, %126 : vector<2x32xf32>
    %128 = arith.mulf %119, %69 : vector<2x32xf32>
    %129 = arith.mulf %113, %121 : vector<2x32xf32>
    %130 = arith.addf %128, %129 : vector<2x32xf32>
    %131 = math.tanh %130 : vector<2x32xf32>
    %132 = arith.mulf %127, %131 : vector<2x32xf32>
    %133 = vector.extract_strided_slice %132 {offsets = [1, 0], sizes = [1, 32], strides = [1, 1]} : vector<2x32xf32> to vector<1x32xf32>
    %134 = vector.extract_strided_slice %7 {offsets = [4, 0], sizes = [2, 128], strides = [1, 1]} : vector<16x128xf32> to vector<2x128xf32>
    %cst_35 = arith.constant dense<0.000000e+00> : vector<2x128xf32>
    %135 = tpu.matmul %102, %2, %cst_35 {dimension_numbers = #tpu.dot_dimension_numbers<[1], [0], [0], [1], [0, 0, 1, 1], [], []>} : vector<2x32xf32>, vector<32x128xf32>, vector<2x128xf32> -> vector<2x128xf32>
    %136 = arith.addf %134, %135 : vector<2x128xf32>
    %137 = vector.broadcast %4 : vector<1x128xf32> to vector<2x128xf32>
    %138 = arith.addf %136, %137 : vector<2x128xf32>
    %139 = vector.extract_strided_slice %138 {offsets = [0, 0], sizes = [2, 32], strides = [1, 1]} : vector<2x128xf32> to vector<2x32xf32>
    %140 = arith.negf %139 : vector<2x32xf32>
    %141 = math.exp %140 : vector<2x32xf32>
    %cst_36 = arith.constant 1.000000e+00 : f32
    %142 = vector.broadcast %cst_36 : f32 to vector<2x32xf32>
    %143 = arith.addf %142, %141 : vector<2x32xf32>
    %144 = arith.divf %142, %143 : vector<2x32xf32>
    %145 = vector.extract_strided_slice %138 {offsets = [0, 32], sizes = [2, 32], strides = [1, 1]} : vector<2x128xf32> to vector<2x32xf32>
    %146 = arith.negf %145 : vector<2x32xf32>
    %147 = math.exp %146 : vector<2x32xf32>
    %cst_37 = arith.constant 1.000000e+00 : f32
    %148 = vector.broadcast %cst_37 : f32 to vector<2x32xf32>
    %149 = arith.addf %148, %147 : vector<2x32xf32>
    %150 = arith.divf %148, %149 : vector<2x32xf32>
    %151 = vector.extract_strided_slice %138 {offsets = [0, 64], sizes = [2, 32], strides = [1, 1]} : vector<2x128xf32> to vector<2x32xf32>
    %152 = math.tanh %151 : vector<2x32xf32>
    %153 = vector.extract_strided_slice %138 {offsets = [0, 96], sizes = [2, 32], strides = [1, 1]} : vector<2x128xf32> to vector<2x32xf32>
    %154 = arith.negf %153 : vector<2x32xf32>
    %155 = math.exp %154 : vector<2x32xf32>
    %cst_38 = arith.constant 1.000000e+00 : f32
    %156 = vector.broadcast %cst_38 : f32 to vector<2x32xf32>
    %157 = arith.addf %156, %155 : vector<2x32xf32>
    %158 = arith.divf %156, %157 : vector<2x32xf32>
    %159 = arith.mulf %150, %100 : vector<2x32xf32>
    %160 = arith.mulf %144, %152 : vector<2x32xf32>
    %161 = arith.addf %159, %160 : vector<2x32xf32>
    %162 = math.tanh %161 : vector<2x32xf32>
    %163 = arith.mulf %158, %162 : vector<2x32xf32>
    %cst_39 = arith.constant dense<0.000000e+00> : vector<2x128xf32>
    %164 = tpu.matmul %163, %1, %cst_39 {dimension_numbers = #tpu.dot_dimension_numbers<[1], [0], [0], [1], [0, 0, 1, 1], [], []>} : vector<2x32xf32>, vector<32x128xf32>, vector<2x128xf32> -> vector<2x128xf32>
    %cst_40 = arith.constant dense<0.000000e+00> : vector<2x128xf32>
    %165 = tpu.matmul %132, %3, %cst_40 {dimension_numbers = #tpu.dot_dimension_numbers<[1], [0], [0], [1], [0, 0, 1, 1], [], []>} : vector<2x32xf32>, vector<32x128xf32>, vector<2x128xf32> -> vector<2x128xf32>
    %166 = arith.addf %164, %165 : vector<2x128xf32>
    %167 = vector.broadcast %5 : vector<1x128xf32> to vector<2x128xf32>
    %168 = arith.addf %166, %167 : vector<2x128xf32>
    %169 = vector.extract_strided_slice %168 {offsets = [0, 0], sizes = [2, 32], strides = [1, 1]} : vector<2x128xf32> to vector<2x32xf32>
    %170 = arith.negf %169 : vector<2x32xf32>
    %171 = math.exp %170 : vector<2x32xf32>
    %cst_41 = arith.constant 1.000000e+00 : f32
    %172 = vector.broadcast %cst_41 : f32 to vector<2x32xf32>
    %173 = arith.addf %172, %171 : vector<2x32xf32>
    %174 = arith.divf %172, %173 : vector<2x32xf32>
    %175 = vector.extract_strided_slice %168 {offsets = [0, 32], sizes = [2, 32], strides = [1, 1]} : vector<2x128xf32> to vector<2x32xf32>
    %176 = arith.negf %175 : vector<2x32xf32>
    %177 = math.exp %176 : vector<2x32xf32>
    %cst_42 = arith.constant 1.000000e+00 : f32
    %178 = vector.broadcast %cst_42 : f32 to vector<2x32xf32>
    %179 = arith.addf %178, %177 : vector<2x32xf32>
    %180 = arith.divf %178, %179 : vector<2x32xf32>
    %181 = vector.extract_strided_slice %168 {offsets = [0, 64], sizes = [2, 32], strides = [1, 1]} : vector<2x128xf32> to vector<2x32xf32>
    %182 = math.tanh %181 : vector<2x32xf32>
    %183 = vector.extract_strided_slice %168 {offsets = [0, 96], sizes = [2, 32], strides = [1, 1]} : vector<2x128xf32> to vector<2x32xf32>
    %184 = arith.negf %183 : vector<2x32xf32>
    %185 = math.exp %184 : vector<2x32xf32>
    %cst_43 = arith.constant 1.000000e+00 : f32
    %186 = vector.broadcast %cst_43 : f32 to vector<2x32xf32>
    %187 = arith.addf %186, %185 : vector<2x32xf32>
    %188 = arith.divf %186, %187 : vector<2x32xf32>
    %189 = arith.mulf %180, %130 : vector<2x32xf32>
    %190 = arith.mulf %174, %182 : vector<2x32xf32>
    %191 = arith.addf %189, %190 : vector<2x32xf32>
    %192 = math.tanh %191 : vector<2x32xf32>
    %193 = arith.mulf %188, %192 : vector<2x32xf32>
    %194 = vector.extract_strided_slice %193 {offsets = [1, 0], sizes = [1, 32], strides = [1, 1]} : vector<2x32xf32> to vector<1x32xf32>
    %195 = vector.extract_strided_slice %7 {offsets = [6, 0], sizes = [2, 128], strides = [1, 1]} : vector<16x128xf32> to vector<2x128xf32>
    %cst_44 = arith.constant dense<0.000000e+00> : vector<2x128xf32>
    %196 = tpu.matmul %163, %2, %cst_44 {dimension_numbers = #tpu.dot_dimension_numbers<[1], [0], [0], [1], [0, 0, 1, 1], [], []>} : vector<2x32xf32>, vector<32x128xf32>, vector<2x128xf32> -> vector<2x128xf32>
    %197 = arith.addf %195, %196 : vector<2x128xf32>
    %198 = vector.broadcast %4 : vector<1x128xf32> to vector<2x128xf32>
    %199 = arith.addf %197, %198 : vector<2x128xf32>
    %200 = vector.extract_strided_slice %199 {offsets = [0, 0], sizes = [2, 32], strides = [1, 1]} : vector<2x128xf32> to vector<2x32xf32>
    %201 = arith.negf %200 : vector<2x32xf32>
    %202 = math.exp %201 : vector<2x32xf32>
    %cst_45 = arith.constant 1.000000e+00 : f32
    %203 = vector.broadcast %cst_45 : f32 to vector<2x32xf32>
    %204 = arith.addf %203, %202 : vector<2x32xf32>
    %205 = arith.divf %203, %204 : vector<2x32xf32>
    %206 = vector.extract_strided_slice %199 {offsets = [0, 32], sizes = [2, 32], strides = [1, 1]} : vector<2x128xf32> to vector<2x32xf32>
    %207 = arith.negf %206 : vector<2x32xf32>
    %208 = math.exp %207 : vector<2x32xf32>
    %cst_46 = arith.constant 1.000000e+00 : f32
    %209 = vector.broadcast %cst_46 : f32 to vector<2x32xf32>
    %210 = arith.addf %209, %208 : vector<2x32xf32>
    %211 = arith.divf %209, %210 : vector<2x32xf32>
    %212 = vector.extract_strided_slice %199 {offsets = [0, 64], sizes = [2, 32], strides = [1, 1]} : vector<2x128xf32> to vector<2x32xf32>
    %213 = math.tanh %212 : vector<2x32xf32>
    %214 = vector.extract_strided_slice %199 {offsets = [0, 96], sizes = [2, 32], strides = [1, 1]} : vector<2x128xf32> to vector<2x32xf32>
    %215 = arith.negf %214 : vector<2x32xf32>
    %216 = math.exp %215 : vector<2x32xf32>
    %cst_47 = arith.constant 1.000000e+00 : f32
    %217 = vector.broadcast %cst_47 : f32 to vector<2x32xf32>
    %218 = arith.addf %217, %216 : vector<2x32xf32>
    %219 = arith.divf %217, %218 : vector<2x32xf32>
    %220 = arith.mulf %211, %161 : vector<2x32xf32>
    %221 = arith.mulf %205, %213 : vector<2x32xf32>
    %222 = arith.addf %220, %221 : vector<2x32xf32>
    %223 = math.tanh %222 : vector<2x32xf32>
    %224 = arith.mulf %219, %223 : vector<2x32xf32>
    %cst_48 = arith.constant dense<0.000000e+00> : vector<2x128xf32>
    %225 = tpu.matmul %224, %1, %cst_48 {dimension_numbers = #tpu.dot_dimension_numbers<[1], [0], [0], [1], [0, 0, 1, 1], [], []>} : vector<2x32xf32>, vector<32x128xf32>, vector<2x128xf32> -> vector<2x128xf32>
    %cst_49 = arith.constant dense<0.000000e+00> : vector<2x128xf32>
    %226 = tpu.matmul %193, %3, %cst_49 {dimension_numbers = #tpu.dot_dimension_numbers<[1], [0], [0], [1], [0, 0, 1, 1], [], []>} : vector<2x32xf32>, vector<32x128xf32>, vector<2x128xf32> -> vector<2x128xf32>
    %227 = arith.addf %225, %226 : vector<2x128xf32>
    %228 = vector.broadcast %5 : vector<1x128xf32> to vector<2x128xf32>
    %229 = arith.addf %227, %228 : vector<2x128xf32>
    %230 = vector.extract_strided_slice %229 {offsets = [0, 0], sizes = [2, 32], strides = [1, 1]} : vector<2x128xf32> to vector<2x32xf32>
    %231 = arith.negf %230 : vector<2x32xf32>
    %232 = math.exp %231 : vector<2x32xf32>
    %cst_50 = arith.constant 1.000000e+00 : f32
    %233 = vector.broadcast %cst_50 : f32 to vector<2x32xf32>
    %234 = arith.addf %233, %232 : vector<2x32xf32>
    %235 = arith.divf %233, %234 : vector<2x32xf32>
    %236 = vector.extract_strided_slice %229 {offsets = [0, 32], sizes = [2, 32], strides = [1, 1]} : vector<2x128xf32> to vector<2x32xf32>
    %237 = arith.negf %236 : vector<2x32xf32>
    %238 = math.exp %237 : vector<2x32xf32>
    %cst_51 = arith.constant 1.000000e+00 : f32
    %239 = vector.broadcast %cst_51 : f32 to vector<2x32xf32>
    %240 = arith.addf %239, %238 : vector<2x32xf32>
    %241 = arith.divf %239, %240 : vector<2x32xf32>
    %242 = vector.extract_strided_slice %229 {offsets = [0, 64], sizes = [2, 32], strides = [1, 1]} : vector<2x128xf32> to vector<2x32xf32>
    %243 = math.tanh %242 : vector<2x32xf32>
    %244 = vector.extract_strided_slice %229 {offsets = [0, 96], sizes = [2, 32], strides = [1, 1]} : vector<2x128xf32> to vector<2x32xf32>
    %245 = arith.negf %244 : vector<2x32xf32>
    %246 = math.exp %245 : vector<2x32xf32>
    %cst_52 = arith.constant 1.000000e+00 : f32
    %247 = vector.broadcast %cst_52 : f32 to vector<2x32xf32>
    %248 = arith.addf %247, %246 : vector<2x32xf32>
    %249 = arith.divf %247, %248 : vector<2x32xf32>
    %250 = arith.mulf %241, %191 : vector<2x32xf32>
    %251 = arith.mulf %235, %243 : vector<2x32xf32>
    %252 = arith.addf %250, %251 : vector<2x32xf32>
    %253 = math.tanh %252 : vector<2x32xf32>
    %254 = arith.mulf %249, %253 : vector<2x32xf32>
    %255 = vector.extract_strided_slice %254 {offsets = [1, 0], sizes = [1, 32], strides = [1, 1]} : vector<2x32xf32> to vector<1x32xf32>
    %256 = vector.extract_strided_slice %7 {offsets = [8, 0], sizes = [2, 128], strides = [1, 1]} : vector<16x128xf32> to vector<2x128xf32>
    %cst_53 = arith.constant dense<0.000000e+00> : vector<2x128xf32>
    %257 = tpu.matmul %224, %2, %cst_53 {dimension_numbers = #tpu.dot_dimension_numbers<[1], [0], [0], [1], [0, 0, 1, 1], [], []>} : vector<2x32xf32>, vector<32x128xf32>, vector<2x128xf32> -> vector<2x128xf32>
    %258 = arith.addf %256, %257 : vector<2x128xf32>
    %259 = vector.broadcast %4 : vector<1x128xf32> to vector<2x128xf32>
    %260 = arith.addf %258, %259 : vector<2x128xf32>
    %261 = vector.extract_strided_slice %260 {offsets = [0, 0], sizes = [2, 32], strides = [1, 1]} : vector<2x128xf32> to vector<2x32xf32>
    %262 = arith.negf %261 : vector<2x32xf32>
    %263 = math.exp %262 : vector<2x32xf32>
    %cst_54 = arith.constant 1.000000e+00 : f32
    %264 = vector.broadcast %cst_54 : f32 to vector<2x32xf32>
    %265 = arith.addf %264, %263 : vector<2x32xf32>
    %266 = arith.divf %264, %265 : vector<2x32xf32>
    %267 = vector.extract_strided_slice %260 {offsets = [0, 32], sizes = [2, 32], strides = [1, 1]} : vector<2x128xf32> to vector<2x32xf32>
    %268 = arith.negf %267 : vector<2x32xf32>
    %269 = math.exp %268 : vector<2x32xf32>
    %cst_55 = arith.constant 1.000000e+00 : f32
    %270 = vector.broadcast %cst_55 : f32 to vector<2x32xf32>
    %271 = arith.addf %270, %269 : vector<2x32xf32>
    %272 = arith.divf %270, %271 : vector<2x32xf32>
    %273 = vector.extract_strided_slice %260 {offsets = [0, 64], sizes = [2, 32], strides = [1, 1]} : vector<2x128xf32> to vector<2x32xf32>
    %274 = math.tanh %273 : vector<2x32xf32>
    %275 = vector.extract_strided_slice %260 {offsets = [0, 96], sizes = [2, 32], strides = [1, 1]} : vector<2x128xf32> to vector<2x32xf32>
    %276 = arith.negf %275 : vector<2x32xf32>
    %277 = math.exp %276 : vector<2x32xf32>
    %cst_56 = arith.constant 1.000000e+00 : f32
    %278 = vector.broadcast %cst_56 : f32 to vector<2x32xf32>
    %279 = arith.addf %278, %277 : vector<2x32xf32>
    %280 = arith.divf %278, %279 : vector<2x32xf32>
    %281 = arith.mulf %272, %222 : vector<2x32xf32>
    %282 = arith.mulf %266, %274 : vector<2x32xf32>
    %283 = arith.addf %281, %282 : vector<2x32xf32>
    %284 = math.tanh %283 : vector<2x32xf32>
    %285 = arith.mulf %280, %284 : vector<2x32xf32>
    %cst_57 = arith.constant dense<0.000000e+00> : vector<2x128xf32>
    %286 = tpu.matmul %285, %1, %cst_57 {dimension_numbers = #tpu.dot_dimension_numbers<[1], [0], [0], [1], [0, 0, 1, 1], [], []>} : vector<2x32xf32>, vector<32x128xf32>, vector<2x128xf32> -> vector<2x128xf32>
    %cst_58 = arith.constant dense<0.000000e+00> : vector<2x128xf32>
    %287 = tpu.matmul %254, %3, %cst_58 {dimension_numbers = #tpu.dot_dimension_numbers<[1], [0], [0], [1], [0, 0, 1, 1], [], []>} : vector<2x32xf32>, vector<32x128xf32>, vector<2x128xf32> -> vector<2x128xf32>
    %288 = arith.addf %286, %287 : vector<2x128xf32>
    %289 = vector.broadcast %5 : vector<1x128xf32> to vector<2x128xf32>
    %290 = arith.addf %288, %289 : vector<2x128xf32>
    %291 = vector.extract_strided_slice %290 {offsets = [0, 0], sizes = [2, 32], strides = [1, 1]} : vector<2x128xf32> to vector<2x32xf32>
    %292 = arith.negf %291 : vector<2x32xf32>
    %293 = math.exp %292 : vector<2x32xf32>
    %cst_59 = arith.constant 1.000000e+00 : f32
    %294 = vector.broadcast %cst_59 : f32 to vector<2x32xf32>
    %295 = arith.addf %294, %293 : vector<2x32xf32>
    %296 = arith.divf %294, %295 : vector<2x32xf32>
    %297 = vector.extract_strided_slice %290 {offsets = [0, 32], sizes = [2, 32], strides = [1, 1]} : vector<2x128xf32> to vector<2x32xf32>
    %298 = arith.negf %297 : vector<2x32xf32>
    %299 = math.exp %298 : vector<2x32xf32>
    %cst_60 = arith.constant 1.000000e+00 : f32
    %300 = vector.broadcast %cst_60 : f32 to vector<2x32xf32>
    %301 = arith.addf %300, %299 : vector<2x32xf32>
    %302 = arith.divf %300, %301 : vector<2x32xf32>
    %303 = vector.extract_strided_slice %290 {offsets = [0, 64], sizes = [2, 32], strides = [1, 1]} : vector<2x128xf32> to vector<2x32xf32>
    %304 = math.tanh %303 : vector<2x32xf32>
    %305 = vector.extract_strided_slice %290 {offsets = [0, 96], sizes = [2, 32], strides = [1, 1]} : vector<2x128xf32> to vector<2x32xf32>
    %306 = arith.negf %305 : vector<2x32xf32>
    %307 = math.exp %306 : vector<2x32xf32>
    %cst_61 = arith.constant 1.000000e+00 : f32
    %308 = vector.broadcast %cst_61 : f32 to vector<2x32xf32>
    %309 = arith.addf %308, %307 : vector<2x32xf32>
    %310 = arith.divf %308, %309 : vector<2x32xf32>
    %311 = arith.mulf %302, %252 : vector<2x32xf32>
    %312 = arith.mulf %296, %304 : vector<2x32xf32>
    %313 = arith.addf %311, %312 : vector<2x32xf32>
    %314 = math.tanh %313 : vector<2x32xf32>
    %315 = arith.mulf %310, %314 : vector<2x32xf32>
    %316 = vector.extract_strided_slice %315 {offsets = [1, 0], sizes = [1, 32], strides = [1, 1]} : vector<2x32xf32> to vector<1x32xf32>
    %317 = vector.extract_strided_slice %7 {offsets = [10, 0], sizes = [2, 128], strides = [1, 1]} : vector<16x128xf32> to vector<2x128xf32>
    %cst_62 = arith.constant dense<0.000000e+00> : vector<2x128xf32>
    %318 = tpu.matmul %285, %2, %cst_62 {dimension_numbers = #tpu.dot_dimension_numbers<[1], [0], [0], [1], [0, 0, 1, 1], [], []>} : vector<2x32xf32>, vector<32x128xf32>, vector<2x128xf32> -> vector<2x128xf32>
    %319 = arith.addf %317, %318 : vector<2x128xf32>
    %320 = vector.broadcast %4 : vector<1x128xf32> to vector<2x128xf32>
    %321 = arith.addf %319, %320 : vector<2x128xf32>
    %322 = vector.extract_strided_slice %321 {offsets = [0, 0], sizes = [2, 32], strides = [1, 1]} : vector<2x128xf32> to vector<2x32xf32>
    %323 = arith.negf %322 : vector<2x32xf32>
    %324 = math.exp %323 : vector<2x32xf32>
    %cst_63 = arith.constant 1.000000e+00 : f32
    %325 = vector.broadcast %cst_63 : f32 to vector<2x32xf32>
    %326 = arith.addf %325, %324 : vector<2x32xf32>
    %327 = arith.divf %325, %326 : vector<2x32xf32>
    %328 = vector.extract_strided_slice %321 {offsets = [0, 32], sizes = [2, 32], strides = [1, 1]} : vector<2x128xf32> to vector<2x32xf32>
    %329 = arith.negf %328 : vector<2x32xf32>
    %330 = math.exp %329 : vector<2x32xf32>
    %cst_64 = arith.constant 1.000000e+00 : f32
    %331 = vector.broadcast %cst_64 : f32 to vector<2x32xf32>
    %332 = arith.addf %331, %330 : vector<2x32xf32>
    %333 = arith.divf %331, %332 : vector<2x32xf32>
    %334 = vector.extract_strided_slice %321 {offsets = [0, 64], sizes = [2, 32], strides = [1, 1]} : vector<2x128xf32> to vector<2x32xf32>
    %335 = math.tanh %334 : vector<2x32xf32>
    %336 = vector.extract_strided_slice %321 {offsets = [0, 96], sizes = [2, 32], strides = [1, 1]} : vector<2x128xf32> to vector<2x32xf32>
    %337 = arith.negf %336 : vector<2x32xf32>
    %338 = math.exp %337 : vector<2x32xf32>
    %cst_65 = arith.constant 1.000000e+00 : f32
    %339 = vector.broadcast %cst_65 : f32 to vector<2x32xf32>
    %340 = arith.addf %339, %338 : vector<2x32xf32>
    %341 = arith.divf %339, %340 : vector<2x32xf32>
    %342 = arith.mulf %333, %283 : vector<2x32xf32>
    %343 = arith.mulf %327, %335 : vector<2x32xf32>
    %344 = arith.addf %342, %343 : vector<2x32xf32>
    %345 = math.tanh %344 : vector<2x32xf32>
    %346 = arith.mulf %341, %345 : vector<2x32xf32>
    %cst_66 = arith.constant dense<0.000000e+00> : vector<2x128xf32>
    %347 = tpu.matmul %346, %1, %cst_66 {dimension_numbers = #tpu.dot_dimension_numbers<[1], [0], [0], [1], [0, 0, 1, 1], [], []>} : vector<2x32xf32>, vector<32x128xf32>, vector<2x128xf32> -> vector<2x128xf32>
    %cst_67 = arith.constant dense<0.000000e+00> : vector<2x128xf32>
    %348 = tpu.matmul %315, %3, %cst_67 {dimension_numbers = #tpu.dot_dimension_numbers<[1], [0], [0], [1], [0, 0, 1, 1], [], []>} : vector<2x32xf32>, vector<32x128xf32>, vector<2x128xf32> -> vector<2x128xf32>
    %349 = arith.addf %347, %348 : vector<2x128xf32>
    %350 = vector.broadcast %5 : vector<1x128xf32> to vector<2x128xf32>
    %351 = arith.addf %349, %350 : vector<2x128xf32>
    %352 = vector.extract_strided_slice %351 {offsets = [0, 0], sizes = [2, 32], strides = [1, 1]} : vector<2x128xf32> to vector<2x32xf32>
    %353 = arith.negf %352 : vector<2x32xf32>
    %354 = math.exp %353 : vector<2x32xf32>
    %cst_68 = arith.constant 1.000000e+00 : f32
    %355 = vector.broadcast %cst_68 : f32 to vector<2x32xf32>
    %356 = arith.addf %355, %354 : vector<2x32xf32>
    %357 = arith.divf %355, %356 : vector<2x32xf32>
    %358 = vector.extract_strided_slice %351 {offsets = [0, 32], sizes = [2, 32], strides = [1, 1]} : vector<2x128xf32> to vector<2x32xf32>
    %359 = arith.negf %358 : vector<2x32xf32>
    %360 = math.exp %359 : vector<2x32xf32>
    %cst_69 = arith.constant 1.000000e+00 : f32
    %361 = vector.broadcast %cst_69 : f32 to vector<2x32xf32>
    %362 = arith.addf %361, %360 : vector<2x32xf32>
    %363 = arith.divf %361, %362 : vector<2x32xf32>
    %364 = vector.extract_strided_slice %351 {offsets = [0, 64], sizes = [2, 32], strides = [1, 1]} : vector<2x128xf32> to vector<2x32xf32>
    %365 = math.tanh %364 : vector<2x32xf32>
    %366 = vector.extract_strided_slice %351 {offsets = [0, 96], sizes = [2, 32], strides = [1, 1]} : vector<2x128xf32> to vector<2x32xf32>
    %367 = arith.negf %366 : vector<2x32xf32>
    %368 = math.exp %367 : vector<2x32xf32>
    %cst_70 = arith.constant 1.000000e+00 : f32
    %369 = vector.broadcast %cst_70 : f32 to vector<2x32xf32>
    %370 = arith.addf %369, %368 : vector<2x32xf32>
    %371 = arith.divf %369, %370 : vector<2x32xf32>
    %372 = arith.mulf %363, %313 : vector<2x32xf32>
    %373 = arith.mulf %357, %365 : vector<2x32xf32>
    %374 = arith.addf %372, %373 : vector<2x32xf32>
    %375 = math.tanh %374 : vector<2x32xf32>
    %376 = arith.mulf %371, %375 : vector<2x32xf32>
    %377 = vector.extract_strided_slice %376 {offsets = [1, 0], sizes = [1, 32], strides = [1, 1]} : vector<2x32xf32> to vector<1x32xf32>
    %378 = vector.extract_strided_slice %7 {offsets = [12, 0], sizes = [2, 128], strides = [1, 1]} : vector<16x128xf32> to vector<2x128xf32>
    %cst_71 = arith.constant dense<0.000000e+00> : vector<2x128xf32>
    %379 = tpu.matmul %346, %2, %cst_71 {dimension_numbers = #tpu.dot_dimension_numbers<[1], [0], [0], [1], [0, 0, 1, 1], [], []>} : vector<2x32xf32>, vector<32x128xf32>, vector<2x128xf32> -> vector<2x128xf32>
    %380 = arith.addf %378, %379 : vector<2x128xf32>
    %381 = vector.broadcast %4 : vector<1x128xf32> to vector<2x128xf32>
    %382 = arith.addf %380, %381 : vector<2x128xf32>
    %383 = vector.extract_strided_slice %382 {offsets = [0, 0], sizes = [2, 32], strides = [1, 1]} : vector<2x128xf32> to vector<2x32xf32>
    %384 = arith.negf %383 : vector<2x32xf32>
    %385 = math.exp %384 : vector<2x32xf32>
    %cst_72 = arith.constant 1.000000e+00 : f32
    %386 = vector.broadcast %cst_72 : f32 to vector<2x32xf32>
    %387 = arith.addf %386, %385 : vector<2x32xf32>
    %388 = arith.divf %386, %387 : vector<2x32xf32>
    %389 = vector.extract_strided_slice %382 {offsets = [0, 32], sizes = [2, 32], strides = [1, 1]} : vector<2x128xf32> to vector<2x32xf32>
    %390 = arith.negf %389 : vector<2x32xf32>
    %391 = math.exp %390 : vector<2x32xf32>
    %cst_73 = arith.constant 1.000000e+00 : f32
    %392 = vector.broadcast %cst_73 : f32 to vector<2x32xf32>
    %393 = arith.addf %392, %391 : vector<2x32xf32>
    %394 = arith.divf %392, %393 : vector<2x32xf32>
    %395 = vector.extract_strided_slice %382 {offsets = [0, 64], sizes = [2, 32], strides = [1, 1]} : vector<2x128xf32> to vector<2x32xf32>
    %396 = math.tanh %395 : vector<2x32xf32>
    %397 = vector.extract_strided_slice %382 {offsets = [0, 96], sizes = [2, 32], strides = [1, 1]} : vector<2x128xf32> to vector<2x32xf32>
    %398 = arith.negf %397 : vector<2x32xf32>
    %399 = math.exp %398 : vector<2x32xf32>
    %cst_74 = arith.constant 1.000000e+00 : f32
    %400 = vector.broadcast %cst_74 : f32 to vector<2x32xf32>
    %401 = arith.addf %400, %399 : vector<2x32xf32>
    %402 = arith.divf %400, %401 : vector<2x32xf32>
    %403 = arith.mulf %394, %344 : vector<2x32xf32>
    %404 = arith.mulf %388, %396 : vector<2x32xf32>
    %405 = arith.addf %403, %404 : vector<2x32xf32>
    %406 = math.tanh %405 : vector<2x32xf32>
    %407 = arith.mulf %402, %406 : vector<2x32xf32>
    %cst_75 = arith.constant dense<0.000000e+00> : vector<2x128xf32>
    %408 = tpu.matmul %407, %1, %cst_75 {dimension_numbers = #tpu.dot_dimension_numbers<[1], [0], [0], [1], [0, 0, 1, 1], [], []>} : vector<2x32xf32>, vector<32x128xf32>, vector<2x128xf32> -> vector<2x128xf32>
    %cst_76 = arith.constant dense<0.000000e+00> : vector<2x128xf32>
    %409 = tpu.matmul %376, %3, %cst_76 {dimension_numbers = #tpu.dot_dimension_numbers<[1], [0], [0], [1], [0, 0, 1, 1], [], []>} : vector<2x32xf32>, vector<32x128xf32>, vector<2x128xf32> -> vector<2x128xf32>
    %410 = arith.addf %408, %409 : vector<2x128xf32>
    %411 = vector.broadcast %5 : vector<1x128xf32> to vector<2x128xf32>
    %412 = arith.addf %410, %411 : vector<2x128xf32>
    %413 = vector.extract_strided_slice %412 {offsets = [0, 0], sizes = [2, 32], strides = [1, 1]} : vector<2x128xf32> to vector<2x32xf32>
    %414 = arith.negf %413 : vector<2x32xf32>
    %415 = math.exp %414 : vector<2x32xf32>
    %cst_77 = arith.constant 1.000000e+00 : f32
    %416 = vector.broadcast %cst_77 : f32 to vector<2x32xf32>
    %417 = arith.addf %416, %415 : vector<2x32xf32>
    %418 = arith.divf %416, %417 : vector<2x32xf32>
    %419 = vector.extract_strided_slice %412 {offsets = [0, 32], sizes = [2, 32], strides = [1, 1]} : vector<2x128xf32> to vector<2x32xf32>
    %420 = arith.negf %419 : vector<2x32xf32>
    %421 = math.exp %420 : vector<2x32xf32>
    %cst_78 = arith.constant 1.000000e+00 : f32
    %422 = vector.broadcast %cst_78 : f32 to vector<2x32xf32>
    %423 = arith.addf %422, %421 : vector<2x32xf32>
    %424 = arith.divf %422, %423 : vector<2x32xf32>
    %425 = vector.extract_strided_slice %412 {offsets = [0, 64], sizes = [2, 32], strides = [1, 1]} : vector<2x128xf32> to vector<2x32xf32>
    %426 = math.tanh %425 : vector<2x32xf32>
    %427 = vector.extract_strided_slice %412 {offsets = [0, 96], sizes = [2, 32], strides = [1, 1]} : vector<2x128xf32> to vector<2x32xf32>
    %428 = arith.negf %427 : vector<2x32xf32>
    %429 = math.exp %428 : vector<2x32xf32>
    %cst_79 = arith.constant 1.000000e+00 : f32
    %430 = vector.broadcast %cst_79 : f32 to vector<2x32xf32>
    %431 = arith.addf %430, %429 : vector<2x32xf32>
    %432 = arith.divf %430, %431 : vector<2x32xf32>
    %433 = arith.mulf %424, %374 : vector<2x32xf32>
    %434 = arith.mulf %418, %426 : vector<2x32xf32>
    %435 = arith.addf %433, %434 : vector<2x32xf32>
    %436 = math.tanh %435 : vector<2x32xf32>
    %437 = arith.mulf %432, %436 : vector<2x32xf32>
    %438 = vector.extract_strided_slice %437 {offsets = [1, 0], sizes = [1, 32], strides = [1, 1]} : vector<2x32xf32> to vector<1x32xf32>
    %439 = vector.extract_strided_slice %7 {offsets = [14, 0], sizes = [2, 128], strides = [1, 1]} : vector<16x128xf32> to vector<2x128xf32>
    %cst_80 = arith.constant dense<0.000000e+00> : vector<2x128xf32>
    %440 = tpu.matmul %407, %2, %cst_80 {dimension_numbers = #tpu.dot_dimension_numbers<[1], [0], [0], [1], [0, 0, 1, 1], [], []>} : vector<2x32xf32>, vector<32x128xf32>, vector<2x128xf32> -> vector<2x128xf32>
    %441 = arith.addf %439, %440 : vector<2x128xf32>
    %442 = vector.broadcast %4 : vector<1x128xf32> to vector<2x128xf32>
    %443 = arith.addf %441, %442 : vector<2x128xf32>
    %444 = vector.extract_strided_slice %443 {offsets = [0, 0], sizes = [2, 32], strides = [1, 1]} : vector<2x128xf32> to vector<2x32xf32>
    %445 = arith.negf %444 : vector<2x32xf32>
    %446 = math.exp %445 : vector<2x32xf32>
    %cst_81 = arith.constant 1.000000e+00 : f32
    %447 = vector.broadcast %cst_81 : f32 to vector<2x32xf32>
    %448 = arith.addf %447, %446 : vector<2x32xf32>
    %449 = arith.divf %447, %448 : vector<2x32xf32>
    %450 = vector.extract_strided_slice %443 {offsets = [0, 32], sizes = [2, 32], strides = [1, 1]} : vector<2x128xf32> to vector<2x32xf32>
    %451 = arith.negf %450 : vector<2x32xf32>
    %452 = math.exp %451 : vector<2x32xf32>
    %cst_82 = arith.constant 1.000000e+00 : f32
    %453 = vector.broadcast %cst_82 : f32 to vector<2x32xf32>
    %454 = arith.addf %453, %452 : vector<2x32xf32>
    %455 = arith.divf %453, %454 : vector<2x32xf32>
    %456 = vector.extract_strided_slice %443 {offsets = [0, 64], sizes = [2, 32], strides = [1, 1]} : vector<2x128xf32> to vector<2x32xf32>
    %457 = math.tanh %456 : vector<2x32xf32>
    %458 = vector.extract_strided_slice %443 {offsets = [0, 96], sizes = [2, 32], strides = [1, 1]} : vector<2x128xf32> to vector<2x32xf32>
    %459 = arith.negf %458 : vector<2x32xf32>
    %460 = math.exp %459 : vector<2x32xf32>
    %cst_83 = arith.constant 1.000000e+00 : f32
    %461 = vector.broadcast %cst_83 : f32 to vector<2x32xf32>
    %462 = arith.addf %461, %460 : vector<2x32xf32>
    %463 = arith.divf %461, %462 : vector<2x32xf32>
    %464 = arith.mulf %455, %405 : vector<2x32xf32>
    %465 = arith.mulf %449, %457 : vector<2x32xf32>
    %466 = arith.addf %464, %465 : vector<2x32xf32>
    %467 = math.tanh %466 : vector<2x32xf32>
    %468 = arith.mulf %463, %467 : vector<2x32xf32>
    %cst_84 = arith.constant dense<0.000000e+00> : vector<2x128xf32>
    %469 = tpu.matmul %468, %1, %cst_84 {dimension_numbers = #tpu.dot_dimension_numbers<[1], [0], [0], [1], [0, 0, 1, 1], [], []>} : vector<2x32xf32>, vector<32x128xf32>, vector<2x128xf32> -> vector<2x128xf32>
    %cst_85 = arith.constant dense<0.000000e+00> : vector<2x128xf32>
    %470 = tpu.matmul %437, %3, %cst_85 {dimension_numbers = #tpu.dot_dimension_numbers<[1], [0], [0], [1], [0, 0, 1, 1], [], []>} : vector<2x32xf32>, vector<32x128xf32>, vector<2x128xf32> -> vector<2x128xf32>
    %471 = arith.addf %469, %470 : vector<2x128xf32>
    %472 = vector.broadcast %5 : vector<1x128xf32> to vector<2x128xf32>
    %473 = arith.addf %471, %472 : vector<2x128xf32>
    %474 = vector.extract_strided_slice %473 {offsets = [0, 0], sizes = [2, 32], strides = [1, 1]} : vector<2x128xf32> to vector<2x32xf32>
    %475 = arith.negf %474 : vector<2x32xf32>
    %476 = math.exp %475 : vector<2x32xf32>
    %cst_86 = arith.constant 1.000000e+00 : f32
    %477 = vector.broadcast %cst_86 : f32 to vector<2x32xf32>
    %478 = arith.addf %477, %476 : vector<2x32xf32>
    %479 = arith.divf %477, %478 : vector<2x32xf32>
    %480 = vector.extract_strided_slice %473 {offsets = [0, 32], sizes = [2, 32], strides = [1, 1]} : vector<2x128xf32> to vector<2x32xf32>
    %481 = arith.negf %480 : vector<2x32xf32>
    %482 = math.exp %481 : vector<2x32xf32>
    %cst_87 = arith.constant 1.000000e+00 : f32
    %483 = vector.broadcast %cst_87 : f32 to vector<2x32xf32>
    %484 = arith.addf %483, %482 : vector<2x32xf32>
    %485 = arith.divf %483, %484 : vector<2x32xf32>
    %486 = vector.extract_strided_slice %473 {offsets = [0, 64], sizes = [2, 32], strides = [1, 1]} : vector<2x128xf32> to vector<2x32xf32>
    %487 = math.tanh %486 : vector<2x32xf32>
    %488 = vector.extract_strided_slice %473 {offsets = [0, 96], sizes = [2, 32], strides = [1, 1]} : vector<2x128xf32> to vector<2x32xf32>
    %489 = arith.negf %488 : vector<2x32xf32>
    %490 = math.exp %489 : vector<2x32xf32>
    %cst_88 = arith.constant 1.000000e+00 : f32
    %491 = vector.broadcast %cst_88 : f32 to vector<2x32xf32>
    %492 = arith.addf %491, %490 : vector<2x32xf32>
    %493 = arith.divf %491, %492 : vector<2x32xf32>
    %494 = arith.mulf %485, %435 : vector<2x32xf32>
    %495 = arith.mulf %479, %487 : vector<2x32xf32>
    %496 = arith.addf %494, %495 : vector<2x32xf32>
    %497 = math.tanh %496 : vector<2x32xf32>
    %498 = arith.mulf %493, %497 : vector<2x32xf32>
    %499 = vector.extract_strided_slice %498 {offsets = [1, 0], sizes = [1, 32], strides = [1, 1]} : vector<2x32xf32> to vector<1x32xf32>
    %500 = tpu.concatenate %72, %133, %194, %255, %316, %377, %438, %499 in 0 : vector<1x32xf32>, vector<1x32xf32>, vector<1x32xf32>, vector<1x32xf32>, vector<1x32xf32>, vector<1x32xf32>, vector<1x32xf32>, vector<1x32xf32> -> vector<8x32xf32>
    %c0_89 = arith.constant 0 : index
    %c0_90 = arith.constant 0 : index
    %501 = vector.load %arg8[%c0_89, %c0_90] : memref<32x4xf32, #tpu.memory_space<vmem>>, vector<32x4xf32>
    %cst_91 = arith.constant dense<0.000000e+00> : vector<8x4xf32>
    %502 = tpu.matmul %500, %501, %cst_91 {dimension_numbers = #tpu.dot_dimension_numbers<[1], [0], [0], [1], [0, 0, 1, 1], [], []>} : vector<8x32xf32>, vector<32x4xf32>, vector<8x4xf32> -> vector<8x4xf32>
    %c0_92 = arith.constant 0 : index
    %c0_93 = arith.constant 0 : index
    %503 = vector.load %arg9[%c0_92, %c0_93] : memref<1x4xf32, #tpu.memory_space<vmem>>, vector<1x4xf32>
    %504 = vector.broadcast %503 : vector<1x4xf32> to vector<8x4xf32>
    %505 = arith.addf %502, %504 : vector<8x4xf32>
    %c0_94 = arith.constant 0 : index
    %c0_95 = arith.constant 0 : index
    %506 = vector.load %arg10[%c0_94, %c0_95] : memref<8x4xf32, #tpu.memory_space<vmem>>, vector<8x4xf32>
    tpu.vector_store %arg10[%c0_94, %c0_95], %505 {strides = array<i32>} : memref<8x4xf32, #tpu.memory_space<vmem>>, vector<8x4xf32>,
    return
  }
  func.func @transform_0(%arg0: i32) -> (i32, i32) {
    %c0_i32 = arith.constant 0 : i32
    %c0_i32_0 = arith.constant 0 : i32
    %c0_i32_1 = arith.constant 0 : i32
    return %c0_i32, %c0_i32_0 : i32, i32
  }
  func.func @transform_1(%arg0: i32) -> (i32, i32) {
    %c0_i32 = arith.constant 0 : i32
    %c0_i32_0 = arith.constant 0 : i32
    %c0_i32_1 = arith.constant 0 : i32
    return %c0_i32, %c0_i32_0 : i32, i32
  }
  func.func @transform_2(%arg0: i32) -> (i32, i32) {
    %c0_i32 = arith.constant 0 : i32
    %c0_i32_0 = arith.constant 0 : i32
    %c0_i32_1 = arith.constant 0 : i32
    return %c0_i32, %c0_i32_0 : i32, i32
  }
  func.func @transform_3(%arg0: i32) -> (i32, i32) {
    %c0_i32 = arith.constant 0 : i32
    %c0_i32_0 = arith.constant 0 : i32
    %c0_i32_1 = arith.constant 0 : i32
    return %c0_i32, %c0_i32_0 : i32, i32
  }
  func.func @transform_4(%arg0: i32) -> (i32, i32) {
    %c0_i32 = arith.constant 0 : i32
    %c0_i32_0 = arith.constant 0 : i32
    %c0_i32_1 = arith.constant 0 : i32
    return %c0_i32, %c0_i32_0 : i32, i32
  }
  func.func @transform_5(%arg0: i32) -> (i32, i32) {
    %c0_i32 = arith.constant 0 : i32
    %c0_i32_0 = arith.constant 0 : i32
    %c0_i32_1 = arith.constant 0 : i32
    return %c0_i32, %c0_i32_0 : i32, i32
  }
  func.func @transform_6(%arg0: i32) -> (i32, i32) {
    %c0_i32 = arith.constant 0 : i32
    %c0_i32_0 = arith.constant 0 : i32
    %c0_i32_1 = arith.constant 0 : i32
    return %c0_i32, %c0_i32_0 : i32, i32
  }
  func.func @transform_7(%arg0: i32) -> (i32, i32) {
    %c0_i32 = arith.constant 0 : i32
    %c0_i32_0 = arith.constant 0 : i32
    %c0_i32_1 = arith.constant 0 : i32
    return %c0_i32, %c0_i32_0 : i32, i32
  }
  func.func @transform_8(%arg0: i32) -> (i32, i32) {
    %c0_i32 = arith.constant 0 : i32
    %c0_i32_0 = arith.constant 0 : i32
    %c0_i32_1 = arith.constant 0 : i32
    return %c0_i32, %c0_i32_0 : i32, i32
  }
  func.func @transform_9(%arg0: i32) -> (i32, i32) {
    %c0_i32 = arith.constant 0 : i32
    %c0_i32_0 = arith.constant 0 : i32
    %c0_i32_1 = arith.constant 0 : i32
    return %c0_i32, %c0_i32_0 : i32, i32
  }
}

</mosaic_0001>

<bundles_post_ra>
// kernel: lstm_forward.1
= control target key start
LH: loop header
LB: loop body
LE: loop exit
PB: predicated region body
PF: predicated region fallthrough
CT: control target
= control target key end

     0   :  { %14 = vsyncpa [#allocation3], 0  ;;  %s3773_s0 = inlined_call_operand.vmem [shape: f32[16,4], index: 0, kind: input, shape index: {}]   ;;  %s3774_s1 = inlined_call_operand.vmem [shape: f32[4,128], index: 1, kind: input, shape index: {}]   ;;  %s3775_s2 = inlined_call_operand.vmem [shape: f32[32,128], index: 2, kind: input, shape index: {}]   ;;  %s3776_s3 = inlined_call_operand.vmem [shape: f32[1,128], index: 3, kind: input, shape index: {}]   ;;  %s3777_s4 = inlined_call_operand.vmem [shape: f32[32,128], index: 4, kind: input, shape index: {}]   ;;  %s3778_s5 = inlined_call_operand.hbm [shape: f32[32,128], index: 5, kind: input, shape index: {}]   ;;  %s3779_s6 = inlined_call_operand.vmem [shape: f32[1,128], index: 6, kind: input, shape index: {}]   ;;  %s3780_s7 = inlined_call_operand.vmem [shape: f32[32,4], index: 7, kind: input, shape index: {}]   ;;  %s3781_s8 = inlined_call_operand.hbm [shape: f32[1,4], index: 8, kind: input, shape index: {}]   ;;  %s3782_s9 = inlined_call_operand.vmem [shape: f32[8,4], index: 9, kind: output, shape index: {}]  }
   0x1   :  { %15 = vsyncpa [#allocation5], 0  ;;  %s3153_s30 = smov [#allocation2]  }
   0x2   :  { %s31_s10 = sshll.u32 %s3153_s30, 4  ;;  %s32_s10 = int_to_ptr.vmem [resolvable:$true] %s31_s10 }
   0x3   :  { %s3117_s11 = scalar_lea.vmem %s32_s10, 512  ;;  %p3122_p1 = scmp.lt.s32.totalorder %s32_s10, %s32_s10 }
   0x4   :  { %p3118_p0 = scmp.ne.s32.totalorder %s32_s10, %s3117_s11  ;;  %p3123_p2 = scmp.lt.s32.totalorder %s3117_s11, %s3117_s11 }
   0x6   :  { %p3124_p3 = por %p3123_p2, %p3122_p1 }
   0x8   :  { %p3125_p4 = pnand %p3124_p3, %p3118_p0 }
   0xa   :  { %3128 = shalt.err (!%p3125_p4)
}
   0xb   :  { %s3154_s12 = smov 128   ;;  %s3155_s13 = smov 8  }
   0xc   :  { %37 = dma.hbm_to_vmem [thread:$0]  %s3778_s5, 512, %s32_s10, [#allocation3], %s3154_s12, %s3154_s12, %s3155_s13  }
   0xd   :  { %s3156_s16 = smov [#allocation4]  }
   0xe   :  { %s48_s17 = sshll.u32 %s3156_s16, 4  ;;  %s49_s17 = int_to_ptr.vmem [resolvable:$true] %s48_s17 }
   0xf   :  { %s3137_s18 = scalar_lea.vmem %s49_s17, 16  ;;  %s3141_s19 = scalar_lea.vmem %s49_s17, 32 }
  0x10   :  { %p3138_p5 = scmp.ne.s32.totalorder %s49_s17, %s3137_s18  ;;  %p3142_p6 = scmp.lt.s32.totalorder %s49_s17, %s49_s17 }
  0x11   :  { %p3143_p7 = scmp.lt.s32.totalorder %s3141_s19, %s3137_s18 }
  0x13   :  { %p3144_p8 = por %p3143_p7, %p3142_p6 }
  0x15   :  { %p3145_p9 = pnand %p3144_p8, %p3138_p5 }
  0x17   :  { %3148 = shalt.err (!%p3145_p9)
}
  0x18   :  { %51 = dma.hbm_to_vmem [thread:$0]  %s3781_s8, 16, %s49_s17, [#allocation5]  }
  0x19   :  { %3149 = dma.done.wait [#allocation3], 512  }
  0x1a   :  { %3150 = vsyncadd [#allocation3], 4294966784 }
  0x1b   :  { %3151 = dma.done.wait [#allocation5], 16  }
  0x1c   :  { %3152 = vsyncadd [#allocation5], 4294967280  ;;  %v3157_v0 = vmov 0.0   ;;  %vm3158_vm0 = vmmov 0   ;;  %vm82_vm1 = vcmask 1043456   ;;  %v3223_v1 = vld [vmem:[%s3775_s2 + $0x18] sm:$0xff] }
  0x1d   :  { %2684 = vmatprep.subr.mxu1 %v3157_v0  ;;  %2692 = vmatprep.mubr.msk.f32.mxu1 %vm3158_vm0, %v3157_v0  ;;  %v58_v2 = vld [vmem:[%s3774_s1] sm:$0xf]  ;;  %vm75_vm2 = vcmask 31744   ;;  %v3236_v4 = vld [vmem:[%s3775_s2 + $0x10] sm:$0xff]  ;;  %v74_v5 = vld [vmem:[%s3773_s0 + $0x8] sm:$0xff]  ;;  %s3159_s13 = smov 64  }
  0x1e   :  { %v73_v3 = vld [vmem:[%s3773_s0] sm:$0xff]  ;;  %2685 = vmatpush3.msra.mxu1 %v3223_v1  ;;  %2679 = vmatprep.subr.msk.mxu0 %vm82_vm1, %v58_v2  ;;  %v3246_v6 = vld [vmem:[%s3775_s2 + $0x8] sm:$0xff]  ;;  %s3160_s14 = smov 32   ;;  %v3283_v25 = vld [vmem:[#allocation2 + $0x18] sm:$0xff]  ;;  %vm161_vm3 = vcmask 261120   ;;  %vm2400_vm4 = vcmask 1040384  }
  0x1f   :  { %2686 = vmatprep.subr.mxu1 %v3157_v0  ;;  %2680 = vmatpush3.msk.msra.mxu0 %vm82_vm1, %v58_v2  ;;  %v3255_v7 = vld [vmem:[%s3775_s2] sm:$0xff]  ;;  %v3285_v26 = vld [vmem:[#allocation2 + $0x10] sm:$0xff]  ;;  %v3291_v27 = vld [vmem:[%s3777_s4 + $0x18] sm:$0xff]  ;;  %vm2402_vm5 = vcmask 1041408   ;;  %vm2404_vm6 = vcmask 1042432   ;;  %vm2407_vm7 = vcmask 1044480  }
  0x20   :  { %2681 = vmatprep.mubr.msk.f32.mxu0 %vm75_vm2, %v73_v3  ;;  %2687 = vmatpush3.msra.mxu1 %v3236_v4  ;;  %v3274_v10 = vld [vmem:[%s3776_s3] ss:$0 sm:$0xff]  ;;  %v3296_v28 = vld [vmem:[%s3777_s4 + $0x10] sm:$0xff]  ;;  %v3299_v29 = vld [vmem:[#allocation2 + $0x8] sm:$0xff]  ;;  %vm2409_vm8 = vcmask 1045504   ;;  %vm2411_vm9 = vcmask 1046528  }
  0x21   :  { %2682 = vmatmul.mubr.msk.f32.vlgmr.msra.gmra.mxu0 %vm75_vm2, %v74_v5  ;;  %2688 = vmatprep.subr.mxu1 %v3157_v0  ;;  %v3307_v30 = vld [vmem:[%s3777_s4 + $0x8] sm:$0xff]  ;;  %v3310_v31 = vld [vmem:[#allocation2] sm:$0xff] }
  0x22   :  { %2689 = vmatpush3.msra.mxu1 %v3246_v6  ;;  %2695 = vmatprep.subr.mxu0 %v3157_v0  ;;  %v3320_v32 = vld [vmem:[%s3777_s4] sm:$0xff] }
  0x23   :  { %2690 = vmatprep.subr.mxu1 %v3157_v0  ;;  %2703 = vmatprep.mubr.msk.f32.mxu0 %vm3158_vm0, %v3157_v0  ;;  %v3365_v39 = vld [vmem:[%s3779_s6] ss:$0 sm:$0xff] }
  0x24   :  { %2691 = vmatpush3.msra.mxu1 %v3255_v7  ;;  %2696 = vmatpush3.msra.mxu0 %v3283_v25 }
  0x25   :  { %2693 = vmatmul.mubr.f32.vlgmr.msra.gmra.mxu1 %v3157_v0  ;;  %2706 = vmatprep.subr.mxu1 %v3157_v0 }
  0x26   :  { %2714 = vmatprep.mubr.msk.f32.mxu1 %vm3158_vm0, %v3157_v0  ;;  %2697 = vmatprep.subr.mxu0 %v3157_v0 }
  0x27   :  { %2707 = vmatpush3.msra.mxu1 %v3291_v27  ;;  %2698 = vmatpush3.msra.mxu0 %v3285_v26 }
  0x28   :  { %2708 = vmatprep.subr.mxu1 %v3157_v0  ;;  %2699 = vmatprep.subr.mxu0 %v3157_v0 }
  0x29   :  { %2709 = vmatpush3.msra.mxu1 %v3296_v28  ;;  %2700 = vmatpush3.msra.mxu0 %v3299_v29 }
  0x2a   :  { %2710 = vmatprep.subr.mxu1 %v3157_v0  ;;  %2701 = vmatprep.subr.mxu0 %v3157_v0 }
  0x2b   :  { %2711 = vmatpush3.msra.mxu1 %v3307_v30  ;;  %2702 = vmatpush3.msra.mxu0 %v3310_v31 }
  0x2c   :  { %2712 = vmatprep.subr.mxu1 %v3157_v0  ;;  %2704 = vmatmul.mubr.f32.vlgmr.msra.gmra.mxu0 %v3157_v0 }
  0x2d   :  { %2717 = vmatprep.subr.mxu0 %v3157_v0  ;;  %2713 = vmatpush3.msra.mxu1 %v3320_v32 }
  0x2e   :  { %2718 = vmatpush3.msra.mxu0 %v3223_v1  ;;  %2725 = vmatprep.mubr.msk.f32.mxu0 %vm3158_vm0, %v3157_v0 }
  0x2f   :  { %2719 = vmatprep.subr.mxu0 %v3157_v0  ;;  %2728 = vmatprep.subr.mxu1 %v3157_v0 }
  0x30   :  { %2720 = vmatpush3.msra.mxu0 %v3236_v4 }
  0x31   :  { %2721 = vmatprep.subr.mxu0 %v3157_v0 }
  0x32   :  { %2722 = vmatpush3.msra.mxu0 %v3246_v6 }
  0x33   :  { %2723 = vmatprep.subr.mxu0 %v3157_v0 }
  0x34   :  { %2724 = vmatpush3.msra.mxu0 %v3255_v7 }
  0x35   :  { %2739 = vmatprep.subr.mxu0 %v3157_v0 }
  0xe1   :  { %v3267_v8 = vpop.f32.mrf.mxu0 }
  0xe3   :  { %v3269_v9 = vpop.f32.mrf.mxu0 }
  0xe5   :  { %v231_v11 = vpop.f32.mrf.mxu1 }
  0xe6   :  { %v235_v12 = vadd.f32 %v231_v11, %v3269_v9 }
  0xe7   :  { %v2694_v13 = vpop.f32.mrf.mxu1 }
  0xe8   :  { %v242_v14 = vadd.f32 %v3274_v10, %v235_v12 }
  0xea   :  { %2967 = vtanh.f32 %v242_v14  ;;  %v2510_v16 = vmul.f32 -1.442695, %v242_v14 }
  0xec   :  { %2969 = vpow2.f32 %v2510_v16  ;;  %v333_v36 = vpop.f32.mrf.mxu0 }
  0xee   :  { %v2705_v37 = vpop.f32.mrf.mxu0 }
  0xf7   :  { %v2968_v15 = vpop.eup %2967 }
  0xf8   :  { %252 = vrot.lane.b32.xlu0 %v2968_v15, %s3159_s13 }
  0xf9   :  { %v2970_v17 = vpop.eup %2969 }
  0xfa   :  { %v246_v18 = vadd.f32 1.0, %v2970_v17 }
  0xfc   :  { %2971 = vrcp.f32 %v246_v18 }
 0x109   :  { %v2972_v19 = vpop.eup %2971 }
 0x10a   :  { %v250_v22 = vmul.f32 0.0, %v2972_v19 }
 0x16a   :  { %v253_v20 = vpop.permute.xlu0 %252 }
 0x16b   :  { %v255_v21 = vmul.f32 %v2972_v19, %v253_v20 }
 0x16d   :  { %257 = vrot.lane.b32.xlu0 %v255_v21, %s3160_s14 }
 0x1df   :  { %v258_v23 = vpop.permute.xlu0 %257 }
 0x1e0   :  { %v3280_v24 = vadd.f32 %v258_v23, %v250_v22 }
 0x1e2   :  { %2973 = vtanh.f32 %v3280_v24  ;;  %v526_v2 = vrot.slane %v3280_v24, 6 }
 0x1ef   :  { %v2974_v33 = vpop.eup %2973 }
 0x1f0   :  { %263 = vrot.lane.b32.xlu1 %v2974_v33, %s3159_s13 }
 0x262   :  { %v264_v34 = vpop.permute.xlu1 %263 }
 0x263   :  { %v266_v35 = vmul.f32 %v2972_v19, %v264_v34 }
 0x265   :  { %338 = vrot.lane.b32.xlu1 %v266_v35, %s3160_s14 }
 0x2d7   :  { %v339_v38 = vpop.permute.xlu1 %338 }
 0x2d8   :  { %2715 = vmatmul.mubr.msk.f32.vlgmr.msra.gmra.mxu1 %vm161_vm3, %v339_v38  ;;  %2726 = vmatmul.mubr.msk.f32.vlgmr.msra.gmra.mxu0 %vm161_vm3, %v339_v38 }
 0x2d9   :  { %2729 = vmatpush3.msra.mxu1 %v3283_v25  ;;  %2740 = vmatpush3.msra.mxu0 %v3291_v27 }
 0x2da   :  { %2730 = vmatprep.subr.mxu1 %v3157_v0  ;;  %2741 = vmatprep.subr.mxu0 %v3157_v0 }
 0x2db   :  { %2731 = vmatpush3.msra.mxu1 %v3285_v26  ;;  %2736 = vmatprep.mubr.msk.f32.mxu1 %vm3158_vm0, %v3157_v0 }
 0x2dc   :  { %2732 = vmatprep.subr.mxu1 %v3157_v0  ;;  %2742 = vmatpush3.msra.mxu0 %v3296_v28 }
 0x2dd   :  { %2733 = vmatpush3.msra.mxu1 %v3299_v29  ;;  %2743 = vmatprep.subr.mxu0 %v3157_v0 }
 0x2de   :  { %2734 = vmatprep.subr.mxu1 %v3157_v0  ;;  %2744 = vmatpush3.msra.mxu0 %v3307_v30 }
 0x2df   :  { %2735 = vmatpush3.msra.mxu1 %v3310_v31  ;;  %2745 = vmatprep.subr.mxu0 %v3157_v0 }
 0x2e0   :  { %2750 = vmatprep.subr.mxu1 %v3157_v0  ;;  %2746 = vmatpush3.msra.mxu0 %v3320_v32 }
 0x2e1   :  { %2747 = vmatprep.mubr.msk.f32.mxu0 %vm3158_vm0, %v3157_v0  ;;  %2761 = vmatprep.subr.mxu0 %v3157_v0 }
 0x398   :  { %v408_v40 = vpop.f32.mrf.mxu1  ;;  %v509_v41 = vpop.f32.mrf.mxu0 }
 0x399   :  { %v409_v42 = vadd.f32 %v408_v40, %v333_v36  ;;  %v514_v43 = vrot.slane %v509_v41, 6 }
 0x39a   :  { %v2716_v44 = vpop.f32.mrf.mxu1  ;;  %v2727_v45 = vpop.f32.mrf.mxu0 }
 0x39b   :  { %v418_v46 = vadd.f32 %v3365_v39, %v409_v42  ;;  %v516_v47 = vadd.f32 %v514_v43, %v3269_v9 }
 0x39d   :  { %2975 = vtanh.f32 %v418_v46  ;;  %v517_v48 = vadd.f32 %v3274_v10, %v516_v47  ;;  %v2513_v51 = vmul.f32 -1.442695, %v418_v46 }
 0x39f   :  { %2977 = vtanh.f32 %v517_v48  ;;  %v2515_v52 = vmul.f32 -1.442695, %v517_v48 }
 0x3a0   :  { %2979 = vpow2.f32 %v2513_v51 }
 0x3a1   :  { %2981 = vpow2.f32 %v2515_v52 }
 0x3aa   :  { %v2976_v49 = vpop.eup %2975 }
 0x3ab   :  { %428 = vrot.lane.b32.xlu0 %v2976_v49, %s3159_s13 }
 0x3ac   :  { %v2978_v50 = vpop.eup %2977 }
 0x3ad   :  { %530 = vrot.lane.b32.xlu1 %v2978_v50, %s3159_s13  ;;  %v2980_v53 = vpop.eup %2979 }
 0x3ae   :  { %v2982_v54 = vpop.eup %2981  ;;  %v422_v55 = vadd.f32 1.0, %v2980_v53 }
 0x3af   :  { %v521_v56 = vadd.f32 1.0, %v2982_v54 }
 0x3b0   :  { %2983 = vrcp.f32 %v422_v55 }
 0x3b1   :  { %2985 = vrcp.f32 %v521_v56 }
 0x3bd   :  { %v2984_v57 = vpop.eup %2983 }
 0x3be   :  { %v2986_v60 = vpop.eup %2985  ;;  %v426_v63 = vmul.f32 0.0, %v2984_v57 }
 0x3bf   :  { %v528_v11 = vmul.f32 %v2986_v60, %v526_v2 }
 0x41d   :  { %v429_v58 = vpop.permute.xlu0 %428 }
 0x41e   :  { %v431_v59 = vmul.f32 %v2984_v57, %v429_v58 }
 0x41f   :  { %v531_v61 = vpop.permute.xlu1 %530 }
 0x420   :  { %433 = vrot.lane.b32.xlu0 %v431_v59, %s3160_s14  ;;  %v533_v62 = vmul.f32 %v2986_v60, %v531_v61 }
 0x422   :  { %535 = vrot.lane.b32.xlu1 %v533_v62, %s3160_s14 }
 0x492   :  { %v434_v3 = vpop.permute.xlu0 %433 }
 0x493   :  { %v3375_v5 = vadd.f32 %v434_v3, %v426_v63 }
 0x494   :  { %v536_v12 = vpop.permute.xlu1 %535 }
 0x495   :  { %2987 = vtanh.f32 %v3375_v5  ;;  %v3378_v13 = vadd.f32 %v536_v12, %v528_v11 }
 0x497   :  { %2989 = vtanh.f32 %v3378_v13 }
 0x4a2   :  { %v2988_v14 = vpop.eup %2987 }
 0x4a3   :  { %439 = vrot.lane.b32.xlu0 %v2988_v14, %s3159_s13 }
 0x4a4   :  { %v2990_v15 = vpop.eup %2989 }
 0x4a5   :  { %541 = vrot.lane.b32.xlu1 %v2990_v15, %s3159_s13 }
 0x515   :  { %v440_v16 = vpop.permute.xlu0 %439 }
 0x516   :  { %v3383_v17 = vmul.f32 %v2984_v57, %v440_v16 }
 0x517   :  { %v542_v18 = vpop.permute.xlu1 %541 }
 0x518   :  { %546 = vrot.lane.b32.xlu0 %v3383_v17, %s3160_s14  ;;  %v544_v19 = vmul.f32 %v2986_v60, %v542_v18  ;;  %v804_v60 = vrot.slane %v3378_v13, 6  ;;  %v2385_v11 = vrot.slane %v3383_v17, 1 }
 0x51a   :  { %v621_v20 = vrot.slane %v544_v19, 2 }
 0x51c   :  { %622 = vrot.lane.b32.xlu1 %v621_v20, %s3160_s14 }
 0x58a   :  { %v547_v21 = vpop.permute.xlu0 %546 }
 0x58b   :  { %2737 = vmatmul.mubr.msk.f32.vlgmr.msra.gmra.mxu1 %vm161_vm3, %v547_v21 }
 0x58c   :  { %2751 = vmatpush3.msra.mxu1 %v3223_v1  ;;  %2758 = vmatprep.mubr.msk.f32.mxu1 %vm3158_vm0, %v3157_v0 }
 0x58d   :  { %2752 = vmatprep.subr.mxu1 %v3157_v0 }
 0x58e   :  { %2753 = vmatpush3.msra.mxu1 %v3236_v4  ;;  %v623_v22 = vpop.permute.xlu1 %622 }
 0x58f   :  { %2754 = vmatprep.subr.mxu1 %v3157_v0  ;;  %2748 = vmatmul.mubr.msk.f32.vlgmr.msra.gmra.mxu0 %vm161_vm3, %v623_v22 }
 0x590   :  { %2755 = vmatpush3.msra.mxu1 %v3246_v6  ;;  %2762 = vmatpush3.msra.mxu0 %v3283_v25 }
 0x591   :  { %2756 = vmatprep.subr.mxu1 %v3157_v0  ;;  %2763 = vmatprep.subr.mxu0 %v3157_v0 }
 0x592   :  { %2757 = vmatpush3.msra.mxu1 %v3255_v7  ;;  %2764 = vmatpush3.msra.mxu0 %v3285_v26 }
 0x593   :  { %2759 = vmatmul.mubr.msk.f32.vlgmr.msra.gmra.mxu1 %vm161_vm3, %v623_v22  ;;  %2765 = vmatprep.subr.mxu0 %v3157_v0 }
 0x594   :  { %2769 = vmatprep.mubr.msk.f32.mxu0 %vm3158_vm0, %v3157_v0  ;;  %2766 = vmatpush3.msra.mxu0 %v3299_v29 }
 0x595   :  { %2772 = vmatprep.subr.mxu1 %v3157_v0  ;;  %2767 = vmatprep.subr.mxu0 %v3157_v0 }
 0x596   :  { %2773 = vmatpush3.msra.mxu1 %v3291_v27  ;;  %2768 = vmatpush3.msra.mxu0 %v3310_v31 }
 0x597   :  { %2774 = vmatprep.subr.mxu1 %v3157_v0  ;;  %2783 = vmatprep.subr.mxu0 %v3157_v0 }
 0x598   :  { %2775 = vmatpush3.msra.mxu1 %v3296_v28  ;;  %2780 = vmatprep.mubr.msk.f32.mxu1 %vm3158_vm0, %v3157_v0 }
 0x599   :  { %2776 = vmatprep.subr.mxu1 %v3157_v0 }
 0x59a   :  { %2777 = vmatpush3.msra.mxu1 %v3307_v30 }
 0x59b   :  { %2778 = vmatprep.subr.mxu1 %v3157_v0 }
 0x59c   :  { %2779 = vmatpush3.msra.mxu1 %v3320_v32 }
 0x59d   :  { %2794 = vmatprep.subr.mxu1 %v3157_v0 }
 0x64b   :  { %v616_v23 = vpop.f32.mrf.mxu1 }
 0x64d   :  { %v2738_v24 = vpop.f32.mrf.mxu1 }
 0x64f   :  { %v692_v33 = vpop.f32.mrf.mxu0 }
 0x650   :  { %v693_v34 = vadd.f32 %v692_v33, %v616_v23 }
 0x651   :  { %v2749_v35 = vpop.f32.mrf.mxu0 }
 0x652   :  { %v696_v36 = vadd.f32 %v3365_v39, %v693_v34 }
 0x653   :  { %v787_v37 = vpop.f32.mrf.mxu1 }
 0x654   :  { %v792_v38 = vrot.slane %v787_v37, 4  ;;  %2991 = vtanh.f32 %v696_v36  ;;  %v2518_v45 = vmul.f32 -1.442695, %v696_v36 }
 0x655   :  { %v2760_v40 = vpop.f32.mrf.mxu1 }
 0x656   :  { %v794_v41 = vadd.f32 %v792_v38, %v3269_v9 }
 0x658   :  { %v795_v42 = vadd.f32 %v3274_v10, %v794_v41 }
 0x65a   :  { %2993 = vtanh.f32 %v795_v42  ;;  %v2520_v46 = vmul.f32 -1.442695, %v795_v42 }
 0x65b   :  { %2995 = vpow2.f32 %v2518_v45 }
 0x65c   :  { %2997 = vpow2.f32 %v2520_v46 }
 0x661   :  { %v2992_v43 = vpop.eup %2991 }
 0x662   :  { %706 = vrot.lane.b32.xlu0 %v2992_v43, %s3159_s13 }
 0x667   :  { %v2994_v44 = vpop.eup %2993 }
 0x668   :  { %808 = vrot.lane.b32.xlu1 %v2994_v44, %s3159_s13  ;;  %v2996_v47 = vpop.eup %2995 }
 0x669   :  { %v700_v48 = vadd.f32 1.0, %v2996_v47  ;;  %v2998_v49 = vpop.eup %2997 }
 0x66a   :  { %v799_v50 = vadd.f32 1.0, %v2998_v49 }
 0x66b   :  { %2999 = vrcp.f32 %v700_v48 }
 0x66c   :  { %3001 = vrcp.f32 %v799_v50 }
 0x678   :  { %v3000_v51 = vpop.eup %2999 }
 0x679   :  { %v3002_v54 = vpop.eup %3001  ;;  %v704_v57 = vmul.f32 %v3000_v51, %v3375_v5 }
 0x67a   :  { %v806_v61 = vmul.f32 %v3002_v54, %v804_v60 }
 0x6d4   :  { %v707_v52 = vpop.permute.xlu0 %706 }
 0x6d5   :  { %v709_v53 = vmul.f32 %v3000_v51, %v707_v52 }
 0x6d7   :  { %711 = vrot.lane.b32.xlu0 %v709_v53, %s3160_s14 }
 0x6da   :  { %v809_v55 = vpop.permute.xlu1 %808 }
 0x6db   :  { %v811_v56 = vmul.f32 %v3002_v54, %v809_v55 }
 0x6dd   :  { %813 = vrot.lane.b32.xlu1 %v811_v56, %s3160_s14 }
 0x749   :  { %v712_v58 = vpop.permute.xlu0 %711 }
 0x74a   :  { %v3429_v59 = vadd.f32 %v712_v58, %v704_v57 }
 0x74c   :  { %3003 = vtanh.f32 %v3429_v59 }
 0x74f   :  { %v814_v62 = vpop.permute.xlu1 %813 }
 0x750   :  { %v3433_v63 = vadd.f32 %v814_v62, %v806_v61 }
 0x752   :  { %3005 = vtanh.f32 %v3433_v63  ;;  %v1082_v53 = vrot.slane %v3433_v63, 6 }
 0x759   :  { %v3004_v2 = vpop.eup %3003 }
 0x75a   :  { %717 = vrot.lane.b32.xlu0 %v3004_v2, %s3159_s13 }
 0x75f   :  { %v3006_v3 = vpop.eup %3005 }
 0x760   :  { %819 = vrot.lane.b32.xlu1 %v3006_v3, %s3159_s13 }
 0x7cc   :  { %v718_v5 = vpop.permute.xlu0 %717 }
 0x7cd   :  { %v720_v12 = vmul.f32 %v3000_v51, %v718_v5 }
 0x7cf   :  { %v3439_v13 = vsel %vm2400_vm4, %v2385_v11, %v720_v12  ;;  %824 = vrot.lane.b32.xlu0 %v720_v12, %s3160_s14 }
 0x7d2   :  { %v820_v14 = vpop.permute.xlu1 %819 }
 0x7d3   :  { %v822_v15 = vmul.f32 %v3002_v54, %v820_v14 }
 0x7d5   :  { %v899_v16 = vrot.slane %v822_v15, 4 }
 0x7d7   :  { %900 = vrot.lane.b32.xlu1 %v899_v16, %s3160_s14 }
 0x841   :  { %v825_v18 = vpop.permute.xlu0 %824 }
 0x842   :  { %2770 = vmatmul.mubr.msk.f32.vlgmr.msra.gmra.mxu0 %vm161_vm3, %v825_v18 }
 0x843   :  { %2784 = vmatpush3.msra.mxu0 %v3223_v1  ;;  %2791 = vmatprep.mubr.msk.f32.mxu0 %vm3158_vm0, %v3157_v0 }
 0x844   :  { %2785 = vmatprep.subr.mxu0 %v3157_v0 }
 0x845   :  { %2786 = vmatpush3.msra.mxu0 %v3236_v4 }
 0x846   :  { %2787 = vmatprep.subr.mxu0 %v3157_v0 }
 0x847   :  { %2788 = vmatpush3.msra.mxu0 %v3246_v6 }
 0x848   :  { %2789 = vmatprep.subr.mxu0 %v3157_v0 }
 0x849   :  { %v901_v17 = vpop.permute.xlu1 %900  ;;  %2790 = vmatpush3.msra.mxu0 %v3255_v7 }
 0x84a   :  { %2781 = vmatmul.mubr.msk.f32.vlgmr.msra.gmra.mxu1 %vm161_vm3, %v901_v17  ;;  %2792 = vmatmul.mubr.msk.f32.vlgmr.msra.gmra.mxu0 %vm161_vm3, %v901_v17 }
 0x84b   :  { %2795 = vmatpush3.msra.mxu1 %v3283_v25  ;;  %2805 = vmatprep.subr.mxu0 %v3157_v0 }
 0x84c   :  { %2796 = vmatprep.subr.mxu1 %v3157_v0  ;;  %2806 = vmatpush3.msra.mxu0 %v3291_v27 }
 0x84d   :  { %2797 = vmatpush3.msra.mxu1 %v3285_v26  ;;  %2807 = vmatprep.subr.mxu0 %v3157_v0 }
 0x84e   :  { %2798 = vmatprep.subr.mxu1 %v3157_v0  ;;  %2802 = vmatprep.mubr.msk.f32.mxu1 %vm3158_vm0, %v3157_v0 }
 0x84f   :  { %2799 = vmatpush3.msra.mxu1 %v3299_v29  ;;  %2808 = vmatpush3.msra.mxu0 %v3296_v28 }
 0x850   :  { %2800 = vmatprep.subr.mxu1 %v3157_v0  ;;  %2809 = vmatprep.subr.mxu0 %v3157_v0 }
 0x851   :  { %2801 = vmatpush3.msra.mxu1 %v3310_v31  ;;  %2810 = vmatpush3.msra.mxu0 %v3307_v30 }
 0x852   :  { %2816 = vmatprep.subr.mxu1 %v3157_v0  ;;  %2811 = vmatprep.subr.mxu0 %v3157_v0 }
 0x853   :  { %2813 = vmatprep.mubr.msk.f32.mxu0 %vm3158_vm0, %v3157_v0  ;;  %2812 = vmatpush3.msra.mxu0 %v3320_v32 }
 0x854   :  { %2827 = vmatprep.subr.mxu0 %v3157_v0 }
 0x902   :  { %v894_v19 = vpop.f32.mrf.mxu0 }
 0x904   :  { %v2771_v20 = vpop.f32.mrf.mxu0 }
 0x90a   :  { %v970_v21 = vpop.f32.mrf.mxu1  ;;  %v1065_v23 = vpop.f32.mrf.mxu0 }
 0x90b   :  { %v971_v22 = vadd.f32 %v970_v21, %v894_v19  ;;  %v1070_v24 = vrot.slane %v1065_v23, 2 }
 0x90c   :  { %v2782_v33 = vpop.f32.mrf.mxu1  ;;  %v2793_v35 = vpop.f32.mrf.mxu0 }
 0x90d   :  { %v974_v34 = vadd.f32 %v3365_v39, %v971_v22  ;;  %v1072_v36 = vadd.f32 %v1070_v24, %v3269_v9 }
 0x90f   :  { %3007 = vtanh.f32 %v974_v34  ;;  %v1073_v37 = vadd.f32 %v3274_v10, %v1072_v36  ;;  %v2523_v41 = vmul.f32 -1.442695, %v974_v34 }
 0x911   :  { %3009 = vtanh.f32 %v1073_v37  ;;  %v2525_v42 = vmul.f32 -1.442695, %v1073_v37 }
 0x912   :  { %3011 = vpow2.f32 %v2523_v41 }
 0x913   :  { %3013 = vpow2.f32 %v2525_v42 }
 0x91c   :  { %v3008_v38 = vpop.eup %3007 }
 0x91d   :  { %984 = vrot.lane.b32.xlu1 %v3008_v38, %s3159_s13 }
 0x91e   :  { %v3010_v40 = vpop.eup %3009 }
 0x91f   :  { %1086 = vrot.lane.b32.xlu0 %v3010_v40, %s3159_s13  ;;  %v3012_v43 = vpop.eup %3011 }
 0x920   :  { %v3014_v44 = vpop.eup %3013  ;;  %v978_v45 = vadd.f32 1.0, %v3012_v43 }
 0x921   :  { %v1077_v46 = vadd.f32 1.0, %v3014_v44 }
 0x922   :  { %3015 = vrcp.f32 %v978_v45 }
 0x923   :  { %3017 = vrcp.f32 %v1077_v46 }
 0x92f   :  { %v3016_v9 = vpop.eup %3015 }
 0x930   :  { %v3018_v49 = vpop.eup %3017  ;;  %v982_v52 = vmul.f32 %v3016_v9, %v3429_v59 }
 0x931   :  { %v1084_v56 = vmul.f32 %v3018_v49, %v1082_v53 }
 0x98f   :  { %v985_v47 = vpop.permute.xlu1 %984 }
 0x990   :  { %v987_v48 = vmul.f32 %v3016_v9, %v985_v47 }
 0x991   :  { %v1087_v50 = vpop.permute.xlu0 %1086 }
 0x992   :  { %989 = vrot.lane.b32.xlu1 %v987_v48, %s3160_s14  ;;  %v1089_v51 = vmul.f32 %v3018_v49, %v1087_v50 }
 0x994   :  { %1091 = vrot.lane.b32.xlu0 %v1089_v51, %s3160_s14 }
 0xa04   :  { %v990_v54 = vpop.permute.xlu1 %989 }
 0xa05   :  { %v3485_v55 = vadd.f32 %v990_v54, %v982_v52 }
 0xa06   :  { %v1092_v57 = vpop.permute.xlu0 %1091 }
 0xa07   :  { %3019 = vtanh.f32 %v3485_v55  ;;  %v3488_v58 = vadd.f32 %v1092_v57, %v1084_v56 }
 0xa09   :  { %3021 = vtanh.f32 %v3488_v58  ;;  %v1357_v47 = vrot.slane %v3488_v58, 6 }
 0xa14   :  { %v3020_v60 = vpop.eup %3019 }
 0xa15   :  { %995 = vrot.lane.b32.xlu1 %v3020_v60, %s3159_s13 }
 0xa16   :  { %v3022_v61 = vpop.eup %3021 }
 0xa17   :  { %1097 = vrot.lane.b32.xlu0 %v3022_v61, %s3159_s13 }
 0xa87   :  { %v996_v59 = vpop.permute.xlu1 %995 }
 0xa88   :  { %v998_v62 = vmul.f32 %v3016_v9, %v996_v59 }
 0xa89   :  { %v1098_v2 = vpop.permute.xlu0 %1097 }
 0xa8a   :  { %v2387_v63 = vrot.slane %v998_v62, 7  ;;  %1102 = vrot.lane.b32.xlu0 %v998_v62, %s3160_s14  ;;  %v1100_v3 = vmul.f32 %v3018_v49, %v1098_v2 }
 0xa8c   :  { %v3495_v5 = vsel %vm2402_vm5, %v3439_v13, %v2387_v63  ;;  %v1177_v11 = vrot.slane %v1100_v3, 6 }
 0xa8e   :  { %1178 = vrot.lane.b32.xlu1 %v1177_v11, %s3160_s14 }
 0xafc   :  { %v1103_v12 = vpop.permute.xlu0 %1102 }
 0xafd   :  { %2803 = vmatmul.mubr.msk.f32.vlgmr.msra.gmra.mxu1 %vm161_vm3, %v1103_v12 }
 0xafe   :  { %2817 = vmatpush3.msra.mxu1 %v3223_v1  ;;  %2824 = vmatprep.mubr.msk.f32.mxu1 %vm3158_vm0, %v3157_v0 }
 0xaff   :  { %2818 = vmatprep.subr.mxu1 %v3157_v0 }
 0xb00   :  { %2819 = vmatpush3.msra.mxu1 %v3236_v4  ;;  %v1179_v14 = vpop.permute.xlu1 %1178 }
 0xb01   :  { %2820 = vmatprep.subr.mxu1 %v3157_v0  ;;  %2814 = vmatmul.mubr.msk.f32.vlgmr.msra.gmra.mxu0 %vm161_vm3, %v1179_v14 }
 0xb02   :  { %2821 = vmatpush3.msra.mxu1 %v3246_v6  ;;  %2828 = vmatpush3.msra.mxu0 %v3283_v25 }
 0xb03   :  { %2822 = vmatprep.subr.mxu1 %v3157_v0  ;;  %2829 = vmatprep.subr.mxu0 %v3157_v0 }
 0xb04   :  { %2823 = vmatpush3.msra.mxu1 %v3255_v7  ;;  %2830 = vmatpush3.msra.mxu0 %v3285_v26 }
 0xb05   :  { %2825 = vmatmul.mubr.msk.f32.vlgmr.msra.gmra.mxu1 %vm161_vm3, %v1179_v14  ;;  %2831 = vmatprep.subr.mxu0 %v3157_v0 }
 0xb06   :  { %2838 = vmatprep.subr.mxu1 %v3157_v0  ;;  %2832 = vmatpush3.msra.mxu0 %v3299_v29 }
 0xb07   :  { %2839 = vmatpush3.msra.mxu1 %v3291_v27  ;;  %2833 = vmatprep.subr.mxu0 %v3157_v0 }
 0xb08   :  { %2840 = vmatprep.subr.mxu1 %v3157_v0  ;;  %2834 = vmatpush3.msra.mxu0 %v3310_v31 }
 0xb09   :  { %2841 = vmatpush3.msra.mxu1 %v3296_v28  ;;  %2835 = vmatprep.mubr.msk.f32.mxu0 %vm3158_vm0, %v3157_v0 }
 0xb0a   :  { %2842 = vmatprep.subr.mxu1 %v3157_v0  ;;  %2849 = vmatprep.subr.mxu0 %v3157_v0 }
 0xb0b   :  { %2843 = vmatpush3.msra.mxu1 %v3307_v30  ;;  %2846 = vmatprep.mubr.msk.f32.mxu1 %vm3158_vm0, %v3157_v0 }
 0xb0c   :  { %2844 = vmatprep.subr.mxu1 %v3157_v0 }
 0xb0d   :  { %2845 = vmatpush3.msra.mxu1 %v3320_v32 }
 0xb0e   :  { %2860 = vmatprep.subr.mxu1 %v3157_v0 }
 0xbbd   :  { %v1172_v13 = vpop.f32.mrf.mxu1 }
 0xbbf   :  { %v2804_v15 = vpop.f32.mrf.mxu1 }
 0xbc1   :  { %v1248_v16 = vpop.f32.mrf.mxu0 }
 0xbc2   :  { %v1249_v18 = vadd.f32 %v1248_v16, %v1172_v13 }
 0xbc3   :  { %v2815_v17 = vpop.f32.mrf.mxu0 }
 0xbc4   :  { %v1252_v19 = vadd.f32 %v3365_v39, %v1249_v18 }
 0xbc5   :  { %v1343_v20 = vpop.f32.mrf.mxu1 }
 0xbc6   :  { %v1347_v21 = vadd.f32 %v3267_v8, %v1343_v20  ;;  %3023 = vtanh.f32 %v1252_v19  ;;  %v2528_v34 = vmul.f32 -1.442695, %v1252_v19 }
 0xbc7   :  { %v2826_v22 = vpop.f32.mrf.mxu1 }
 0xbc8   :  { %v1348_v23 = vadd.f32 %v3274_v10, %v1347_v21 }
 0xbca   :  { %3025 = vtanh.f32 %v1348_v23  ;;  %v2530_v35 = vmul.f32 -1.442695, %v1348_v23 }
 0xbcb   :  { %3027 = vpow2.f32 %v2528_v34 }
 0xbcc   :  { %3029 = vpow2.f32 %v2530_v35 }
 0xbd3   :  { %v3024_v24 = vpop.eup %3023 }
 0xbd4   :  { %1262 = vrot.lane.b32.xlu0 %v3024_v24, %s3159_s13 }
 0xbd7   :  { %v3026_v33 = vpop.eup %3025 }
 0xbd8   :  { %1361 = vrot.lane.b32.xlu1 %v3026_v33, %s3159_s13  ;;  %v3028_v36 = vpop.eup %3027 }
 0xbd9   :  { %v3030_v37 = vpop.eup %3029  ;;  %v1256_v38 = vadd.f32 1.0, %v3028_v36 }
 0xbda   :  { %v1352_v40 = vadd.f32 1.0, %v3030_v37 }
 0xbdb   :  { %3031 = vrcp.f32 %v1256_v38 }
 0xbdc   :  { %3033 = vrcp.f32 %v1352_v40 }
 0xbe8   :  { %v3032_v41 = vpop.eup %3031 }
 0xbe9   :  { %v3034_v44 = vpop.eup %3033  ;;  %v1260_v9 = vmul.f32 %v3032_v41, %v3485_v55 }
 0xbea   :  { %v1359_v50 = vmul.f32 %v3034_v44, %v1357_v47 }
 0xc46   :  { %v1263_v42 = vpop.permute.xlu0 %1262 }
 0xc47   :  { %v1265_v43 = vmul.f32 %v3032_v41, %v1263_v42 }
 0xc49   :  { %1267 = vrot.lane.b32.xlu0 %v1265_v43, %s3160_s14 }
 0xc4a   :  { %v1362_v45 = vpop.permute.xlu1 %1361 }
 0xc4b   :  { %v1364_v46 = vmul.f32 %v3034_v44, %v1362_v45 }
 0xc4d   :  { %1366 = vrot.lane.b32.xlu1 %v1364_v46, %s3160_s14 }
 0xcbb   :  { %v1268_v48 = vpop.permute.xlu0 %1267 }
 0xcbc   :  { %v3540_v49 = vadd.f32 %v1268_v48, %v1260_v9 }
 0xcbe   :  { %3035 = vtanh.f32 %v3540_v49 }
 0xcbf   :  { %v1367_v51 = vpop.permute.xlu1 %1366 }
 0xcc0   :  { %v3543_v52 = vadd.f32 %v1367_v51, %v1359_v50 }
 0xcc2   :  { %3037 = vtanh.f32 %v3543_v52  ;;  %v1634_v38 = vrot.slane %v3543_v52, 6  ;;  %v3613_v52 = vld [vmem:[%s3775_s2 + $0x18] sm:$0xff] }
 0xccb   :  { %v3036_v53 = vpop.eup %3035 }
 0xccc   :  { %1273 = vrot.lane.b32.xlu0 %v3036_v53, %s3159_s13  ;;  %v3622_v53 = vld [vmem:[%s3775_s2 + $0x10] sm:$0xff] }
 0xccf   :  { %v3038_v54 = vpop.eup %3037 }
 0xcd0   :  { %1372 = vrot.lane.b32.xlu1 %v3038_v54, %s3159_s13  ;;  %v3629_v54 = vld [vmem:[%s3775_s2 + $0x8] sm:$0xff] }
 0xd3e   :  { %v1274_v55 = vpop.permute.xlu0 %1273 }
 0xd3f   :  { %v1276_v56 = vmul.f32 %v3032_v41, %v1274_v55  ;;  %v3636_v55 = vld [vmem:[%s3775_s2] sm:$0xff] }
 0xd41   :  { %v2389_v57 = vrot.slane %v1276_v56, 6  ;;  %1377 = vrot.lane.b32.xlu0 %v1276_v56, %s3160_s14 }
 0xd42   :  { %v1373_v58 = vpop.permute.xlu1 %1372 }
 0xd43   :  { %v1375_v60 = vmul.f32 %v3034_v44, %v1373_v58  ;;  %v3550_v61 = vsel %vm2404_vm6, %v3495_v5, %v2389_v57 }
 0xd45   :  { %1452 = vrot.lane.b32.xlu1 %v1375_v60, %s3160_s14 }
 0xdb3   :  { %v1378_v59 = vpop.permute.xlu0 %1377 }
 0xdb4   :  { %2836 = vmatmul.mubr.msk.f32.vlgmr.msra.gmra.mxu0 %vm161_vm3, %v1378_v59 }
 0xdb5   :  { %2850 = vmatpush3.msra.mxu0 %v3223_v1  ;;  %2857 = vmatprep.mubr.msk.f32.mxu0 %vm3158_vm0, %v3157_v0 }
 0xdb6   :  { %2851 = vmatprep.subr.mxu0 %v3157_v0 }
 0xdb7   :  { %v1453_v62 = vpop.permute.xlu1 %1452  ;;  %2852 = vmatpush3.msra.mxu0 %v3236_v4 }
 0xdb8   :  { %2847 = vmatmul.mubr.msk.f32.vlgmr.msra.gmra.mxu1 %vm161_vm3, %v1453_v62  ;;  %2853 = vmatprep.subr.mxu0 %v3157_v0 }
 0xdb9   :  { %2861 = vmatpush3.msra.mxu1 %v3283_v25  ;;  %2854 = vmatpush3.msra.mxu0 %v3246_v6 }
 0xdba   :  { %2862 = vmatprep.subr.mxu1 %v3157_v0  ;;  %2855 = vmatprep.subr.mxu0 %v3157_v0 }
 0xdbb   :  { %2863 = vmatpush3.msra.mxu1 %v3285_v26  ;;  %2856 = vmatpush3.msra.mxu0 %v3255_v7 }
 0xdbc   :  { %2864 = vmatprep.subr.mxu1 %v3157_v0  ;;  %2858 = vmatmul.mubr.msk.f32.vlgmr.msra.gmra.mxu0 %vm161_vm3, %v1453_v62 }
 0xdbd   :  { %2865 = vmatpush3.msra.mxu1 %v3299_v29  ;;  %2868 = vmatprep.mubr.msk.f32.mxu1 %vm3158_vm0, %v3157_v0 }
 0xdbe   :  { %2866 = vmatprep.subr.mxu1 %v3157_v0  ;;  %2871 = vmatprep.subr.mxu0 %v3157_v0 }
 0xdbf   :  { %2867 = vmatpush3.msra.mxu1 %v3310_v31  ;;  %2872 = vmatpush3.msra.mxu0 %v3291_v27 }
 0xdc0   :  { %2882 = vmatprep.subr.mxu1 %v3157_v0  ;;  %2873 = vmatprep.subr.mxu0 %v3157_v0 }
 0xdc1   :  { %2879 = vmatprep.mubr.msk.f32.mxu0 %vm3158_vm0, %v3157_v0  ;;  %2874 = vmatpush3.msra.mxu0 %v3296_v28 }
 0xdc2   :  { %2875 = vmatprep.subr.mxu0 %v3157_v0 }
 0xdc3   :  { %2876 = vmatpush3.msra.mxu0 %v3307_v30 }
 0xdc4   :  { %2877 = vmatprep.subr.mxu0 %v3157_v0 }
 0xdc5   :  { %2878 = vmatpush3.msra.mxu0 %v3320_v32 }
 0xdc6   :  { %2893 = vmatprep.subr.mxu0 %v3157_v0 }
 0xe74   :  { %v1447_v1 = vpop.f32.mrf.mxu0 }
 0xe76   :  { %v2837_v4 = vpop.f32.mrf.mxu0 }
 0xe78   :  { %v1522_v6 = vpop.f32.mrf.mxu1 }
 0xe79   :  { %v1523_v7 = vadd.f32 %v1522_v6, %v1447_v1 }
 0xe7a   :  { %v2848_v63 = vpop.f32.mrf.mxu1 }
 0xe7b   :  { %v1526_v2 = vadd.f32 %v3365_v39, %v1523_v7 }
 0xe7c   :  { %v1617_v3 = vpop.f32.mrf.mxu0 }
 0xe7d   :  { %3039 = vtanh.f32 %v1526_v2  ;;  %v1622_v5 = vrot.slane %v1617_v3, 6  ;;  %v2533_v16 = vmul.f32 -1.442695, %v1526_v2 }
 0xe7e   :  { %v2859_v11 = vpop.f32.mrf.mxu0 }
 0xe7f   :  { %v1624_v12 = vadd.f32 %v3267_v8, %v1622_v5 }
 0xe81   :  { %v1625_v14 = vadd.f32 %v3274_v10, %v1624_v12 }
 0xe83   :  { %3041 = vtanh.f32 %v1625_v14  ;;  %v2535_v18 = vmul.f32 -1.442695, %v1625_v14 }
 0xe84   :  { %3043 = vpow2.f32 %v2533_v16 }
 0xe85   :  { %3045 = vpow2.f32 %v2535_v18 }
 0xe8a   :  { %v3040_v13 = vpop.eup %3039 }
 0xe8b   :  { %1536 = vrot.lane.b32.xlu0 %v3040_v13, %s3159_s13 }
 0xe90   :  { %v3042_v15 = vpop.eup %3041 }
 0xe91   :  { %1638 = vrot.lane.b32.xlu1 %v3042_v15, %s3159_s13  ;;  %v3044_v17 = vpop.eup %3043 }
 0xe92   :  { %v1530_v19 = vadd.f32 1.0, %v3044_v17  ;;  %v3046_v20 = vpop.eup %3045 }
 0xe93   :  { %v1629_v21 = vadd.f32 1.0, %v3046_v20 }
 0xe94   :  { %3047 = vrcp.f32 %v1530_v19 }
 0xe95   :  { %3049 = vrcp.f32 %v1629_v21 }
 0xea1   :  { %v3048_v22 = vpop.eup %3047 }
 0xea2   :  { %v3050_v24 = vpop.eup %3049  ;;  %v1534_v35 = vmul.f32 %v3048_v22, %v3540_v49 }
 0xea3   :  { %v1636_v40 = vmul.f32 %v3050_v24, %v1634_v38 }
 0xefd   :  { %v1537_v23 = vpop.permute.xlu0 %1536 }
 0xefe   :  { %v1539_v10 = vmul.f32 %v3048_v22, %v1537_v23 }
 0xf00   :  { %1541 = vrot.lane.b32.xlu0 %v1539_v10, %s3160_s14 }
 0xf03   :  { %v1639_v33 = vpop.permute.xlu1 %1638 }
 0xf04   :  { %v1641_v34 = vmul.f32 %v3050_v24, %v1639_v33 }
 0xf06   :  { %1643 = vrot.lane.b32.xlu1 %v1641_v34, %s3160_s14 }
 0xf72   :  { %v1542_v36 = vpop.permute.xlu0 %1541 }
 0xf73   :  { %v3594_v37 = vadd.f32 %v1542_v36, %v1534_v35 }
 0xf75   :  { %3051 = vtanh.f32 %v3594_v37 }
 0xf78   :  { %v1644_v41 = vpop.permute.xlu1 %1643 }
 0xf79   :  { %v3598_v42 = vadd.f32 %v1644_v41, %v1636_v40  ;;  %v3100_v40 = vld [vmem:[#allocation2 + $0x18] sm:$0xff]  ;;  %v3101_v41 = vld [vmem:[#allocation2 + $0x10] sm:$0xff] }
 0xf7b   :  { %3053 = vtanh.f32 %v3598_v42  ;;  %v1912_v15 = vrot.slane %v3598_v42, 6  ;;  %v3102_v42 = vld [vmem:[#allocation2 + $0x8] sm:$0xff] }
 0xf82   :  { %v3052_v43 = vpop.eup %3051 }
 0xf83   :  { %1547 = vrot.lane.b32.xlu0 %v3052_v43, %s3159_s13  ;;  %v3103_v43 = vld [vmem:[%s3777_s4 + $0x18] sm:$0xff] }
 0xf88   :  { %v3054_v44 = vpop.eup %3053 }
 0xf89   :  { %1649 = vrot.lane.b32.xlu1 %v3054_v44, %s3159_s13  ;;  %v3104_v44 = vld [vmem:[#allocation2] sm:$0xff] }
 0xff5   :  { %v1548_v45 = vpop.permute.xlu0 %1547 }
 0xff6   :  { %v1550_v46 = vmul.f32 %v3048_v22, %v1548_v45  ;;  %v3105_v45 = vld [vmem:[%s3777_s4 + $0x10] sm:$0xff] }
 0xff8   :  { %v2391_v9 = vrot.slane %v1550_v46, 5  ;;  %1654 = vrot.lane.b32.xlu0 %v1550_v46, %s3160_s14  ;;  %v3106_v46 = vld [vmem:[%s3777_s4 + $0x8] sm:$0xff] }
 0xffa   :  { %v3606_v47 = vsel %vm82_vm1, %v3550_v61, %v2391_v9  ;;  %v3107_v9 = vld [vmem:[%s3777_s4] sm:$0xff] }
 0xffb   :  { %v1650_v48 = vpop.permute.xlu1 %1649 }
 0xffc   :  { %v1652_v49 = vmul.f32 %v3050_v24, %v1650_v48 }
 0xffe   :  { %v1729_v50 = vrot.slane %v1652_v49, 2 }
0x1000   :  { %1730 = vrot.lane.b32.xlu1 %v1729_v50, %s3160_s14 }
0x106a   :  { %v1655_v51 = vpop.permute.xlu0 %1654 }
0x106b   :  { %2869 = vmatmul.mubr.msk.f32.vlgmr.msra.gmra.mxu1 %vm161_vm3, %v1655_v51 }
0x106c   :  { %2883 = vmatpush3.msra.mxu1 %v3613_v52  ;;  %2890 = vmatprep.mubr.msk.f32.mxu1 %vm3158_vm0, %v3157_v0 }
0x106d   :  { %2884 = vmatprep.subr.mxu1 %v3157_v0 }
0x106e   :  { %2885 = vmatpush3.msra.mxu1 %v3622_v53 }
0x106f   :  { %2886 = vmatprep.subr.mxu1 %v3157_v0 }
0x1070   :  { %2887 = vmatpush3.msra.mxu1 %v3629_v54 }
0x1071   :  { %2888 = vmatprep.subr.mxu1 %v3157_v0 }
0x1072   :  { %2889 = vmatpush3.msra.mxu1 %v3636_v55  ;;  %v1731_v56 = vpop.permute.xlu1 %1730 }
0x1073   :  { %2904 = vmatprep.subr.mxu1 %v3157_v0  ;;  %2880 = vmatmul.mubr.msk.f32.vlgmr.msra.gmra.mxu0 %vm161_vm3, %v1731_v56 }
0x1074   :  { %2891 = vmatmul.mubr.msk.f32.vlgmr.msra.gmra.mxu1 %vm161_vm3, %v1731_v56  ;;  %2894 = vmatpush3.msra.mxu0 %v3283_v25 }
0x1075   :  { %2905 = vmatpush3.msra.mxu1 %v3291_v27  ;;  %2895 = vmatprep.subr.mxu0 %v3157_v0 }
0x1076   :  { %2906 = vmatprep.subr.mxu1 %v3157_v0  ;;  %2896 = vmatpush3.msra.mxu0 %v3285_v26 }
0x1077   :  { %2901 = vmatprep.mubr.msk.f32.mxu0 %vm3158_vm0, %v3157_v0  ;;  %2897 = vmatprep.subr.mxu0 %v3157_v0 }
0x1078   :  { %2907 = vmatpush3.msra.mxu1 %v3296_v28  ;;  %2898 = vmatpush3.msra.mxu0 %v3299_v29 }
0x1079   :  { %2908 = vmatprep.subr.mxu1 %v3157_v0  ;;  %2899 = vmatprep.subr.mxu0 %v3157_v0 }
0x107a   :  { %2909 = vmatpush3.msra.mxu1 %v3307_v30  ;;  %2900 = vmatpush3.msra.mxu0 %v3310_v31 }
0x107b   :  { %2910 = vmatprep.subr.mxu1 %v3157_v0  ;;  %2915 = vmatprep.subr.mxu0 %v3157_v0 }
0x107c   :  { %2911 = vmatpush3.msra.mxu1 %v3320_v32  ;;  %2912 = vmatprep.mubr.msk.f32.mxu1 %vm3158_vm0, %v3157_v0  ;;  %v3667_v32 = vld [vmem:[%s3776_s3] ss:$0 sm:$0xff] }
0x107d   :  { %2926 = vmatprep.subr.mxu1 %v3157_v0 }
0x112b   :  { %v1724_v25 = vpop.f32.mrf.mxu1 }
0x112d   :  { %v2870_v26 = vpop.f32.mrf.mxu1 }
0x1133   :  { %v1800_v27 = vpop.f32.mrf.mxu0 }
0x1134   :  { %v1895_v28 = vpop.f32.mrf.mxu1  ;;  %v1801_v29 = vadd.f32 %v1800_v27, %v1724_v25 }
0x1135   :  { %v1900_v57 = vrot.slane %v1895_v28, 4  ;;  %v2881_v30 = vpop.f32.mrf.mxu0 }
0x1136   :  { %v2892_v58 = vpop.f32.mrf.mxu1  ;;  %v1804_v31 = vadd.f32 %v3365_v39, %v1801_v29 }
0x1137   :  { %v1902_v60 = vadd.f32 %v3267_v8, %v1900_v57 }
0x1138   :  { %3055 = vtanh.f32 %v1804_v31  ;;  %v2538_v1 = vmul.f32 -1.442695, %v1804_v31 }
0x1139   :  { %v1903_v61 = vadd.f32 %v3667_v32, %v1902_v60 }
0x113b   :  { %3057 = vtanh.f32 %v1903_v61  ;;  %v2540_v4 = vmul.f32 -1.442695, %v1903_v61 }
0x113c   :  { %3059 = vpow2.f32 %v2538_v1 }
0x113d   :  { %3061 = vpow2.f32 %v2540_v4 }
0x1145   :  { %v3056_v59 = vpop.eup %3055 }
0x1146   :  { %1814 = vrot.lane.b32.xlu0 %v3056_v59, %s3159_s13 }
0x1148   :  { %v3058_v62 = vpop.eup %3057 }
0x1149   :  { %1916 = vrot.lane.b32.xlu1 %v3058_v62, %s3159_s13  ;;  %v3060_v39 = vpop.eup %3059 }
0x114a   :  { %v3062_v6 = vpop.eup %3061  ;;  %v1808_v7 = vadd.f32 1.0, %v3060_v39 }
0x114b   :  { %v1907_v63 = vadd.f32 1.0, %v3062_v6 }
0x114c   :  { %3063 = vrcp.f32 %v1808_v7 }
0x114d   :  { %3065 = vrcp.f32 %v1907_v63 }
0x1159   :  { %v3064_v2 = vpop.eup %3063 }
0x115a   :  { %v3066_v11 = vpop.eup %3065  ;;  %v1812_v13 = vmul.f32 %v3064_v2, %v3594_v37 }
0x115b   :  { %v1914_v17 = vmul.f32 %v3066_v11, %v1912_v15 }
0x11b8   :  { %v1815_v3 = vpop.permute.xlu0 %1814 }
0x11b9   :  { %v1817_v5 = vmul.f32 %v3064_v2, %v1815_v3 }
0x11bb   :  { %v1917_v12 = vpop.permute.xlu1 %1916  ;;  %1819 = vrot.lane.b32.xlu0 %v1817_v5, %s3160_s14 }
0x11bc   :  { %v1919_v14 = vmul.f32 %v3066_v11, %v1917_v12 }
0x11be   :  { %1921 = vrot.lane.b32.xlu1 %v1919_v14, %s3160_s14 }
0x122d   :  { %v1820_v16 = vpop.permute.xlu0 %1819 }
0x122e   :  { %v3676_v18 = vadd.f32 %v1820_v16, %v1812_v13 }
0x1230   :  { %3067 = vtanh.f32 %v3676_v18  ;;  %v1922_v19 = vpop.permute.xlu1 %1921 }
0x1231   :  { %v3679_v20 = vadd.f32 %v1922_v19, %v1914_v17 }
0x1233   :  { %3069 = vtanh.f32 %v3679_v20  ;;  %v2190_v7 = vrot.slane %v3679_v20, 6 }
0x123d   :  { %v3068_v21 = vpop.eup %3067 }
0x123e   :  { %1825 = vrot.lane.b32.xlu0 %v3068_v21, %s3159_s13 }
0x1240   :  { %v3070_v22 = vpop.eup %3069 }
0x1241   :  { %1927 = vrot.lane.b32.xlu1 %v3070_v22, %s3159_s13 }
0x12b0   :  { %v1826_v23 = vpop.permute.xlu0 %1825 }
0x12b1   :  { %v1828_v10 = vmul.f32 %v3064_v2, %v1826_v23 }
0x12b3   :  { %v2393_v24 = vrot.slane %v1828_v10, 4  ;;  %v1928_v33 = vpop.permute.xlu1 %1927  ;;  %1932 = vrot.lane.b32.xlu0 %v1828_v10, %s3160_s14 }
0x12b4   :  { %v1930_v34 = vmul.f32 %v3066_v11, %v1928_v33 }
0x12b5   :  { %v3686_v35 = vsel %vm2407_vm7, %v3606_v47, %v2393_v24 }
0x12b6   :  { %v2007_v36 = vrot.slane %v1930_v34, 4 }
0x12b8   :  { %2008 = vrot.lane.b32.xlu1 %v2007_v36, %s3160_s14 }
0x1325   :  { %v1933_v37 = vpop.permute.xlu0 %1932 }
0x1326   :  { %2902 = vmatmul.mubr.msk.f32.vlgmr.msra.gmra.mxu0 %vm161_vm3, %v1933_v37 }
0x1327   :  { %2916 = vmatpush3.msra.mxu0 %v3613_v52  ;;  %2923 = vmatprep.mubr.msk.f32.mxu0 %vm3158_vm0, %v3157_v0  ;;  %v3728_v52 = vld [vmem:[%s3779_s6] ss:$0 sm:$0xff] }
0x1328   :  { %2917 = vmatprep.subr.mxu0 %v3157_v0 }
0x1329   :  { %2918 = vmatpush3.msra.mxu0 %v3622_v53 }
0x132a   :  { %2919 = vmatprep.subr.mxu0 %v3157_v0  ;;  %v2009_v38 = vpop.permute.xlu1 %2008 }
0x132b   :  { %2913 = vmatmul.mubr.msk.f32.vlgmr.msra.gmra.mxu1 %vm161_vm3, %v2009_v38  ;;  %2920 = vmatpush3.msra.mxu0 %v3629_v54 }
0x132c   :  { %2921 = vmatprep.subr.mxu0 %v3157_v0  ;;  %2927 = vmatpush3.msra.mxu1 %v3100_v40 }
0x132d   :  { %2922 = vmatpush3.msra.mxu0 %v3636_v55  ;;  %2928 = vmatprep.subr.mxu1 %v3157_v0 }
0x132e   :  { %2924 = vmatmul.mubr.msk.f32.vlgmr.msra.gmra.mxu0 %vm161_vm3, %v2009_v38  ;;  %2929 = vmatpush3.msra.mxu1 %v3101_v41 }
0x132f   :  { %2930 = vmatprep.subr.mxu1 %v3157_v0  ;;  %2934 = vmatprep.mubr.msk.f32.mxu1 %vm3158_vm0, %v3157_v0 }
0x1330   :  { %2931 = vmatpush3.msra.mxu1 %v3102_v42  ;;  %2937 = vmatprep.subr.mxu0 %v3157_v0 }
0x1331   :  { %2932 = vmatprep.subr.mxu1 %v3157_v0  ;;  %2938 = vmatpush3.msra.mxu0 %v3103_v43 }
0x1332   :  { %2933 = vmatpush3.msra.mxu1 %v3104_v44  ;;  %2939 = vmatprep.subr.mxu0 %v3157_v0 }
0x1333   :  { %2940 = vmatpush3.msra.mxu0 %v3105_v45  ;;  %2945 = vmatprep.mubr.msk.f32.mxu0 %vm3158_vm0, %v3157_v0  ;;  %v2416_v45 = vld [vmem:[%s3780_s7 + $0x18] sm:$0xff] }
0x1334   :  { %2941 = vmatprep.subr.mxu0 %v3157_v0  ;;  %2948 = vmatprep.subr.mxu1 %v3157_v0 }
0x1335   :  { %2942 = vmatpush3.msra.mxu0 %v3106_v46  ;;  %v2415_v46 = vld [vmem:[%s3780_s7 + $0x10] sm:$0xff] }
0x1336   :  { %2943 = vmatprep.subr.mxu0 %v3157_v0 }
0x1337   :  { %2944 = vmatpush3.msra.mxu0 %v3107_v9  ;;  %v2414_v9 = vld [vmem:[%s3780_s7 + $0x8] sm:$0xff] }
0x13e6   :  { %v2002_v47 = vpop.f32.mrf.mxu0 }
0x13e8   :  { %v2903_v48 = vpop.f32.mrf.mxu0 }
0x13eb   :  { %v2078_v49 = vpop.f32.mrf.mxu1 }
0x13ec   :  { %v2079_v50 = vadd.f32 %v2078_v49, %v2002_v47  ;;  %v2413_v47 = vld [vmem:[%s3780_s7] sm:$0xff] }
0x13ed   :  { %v2914_v51 = vpop.f32.mrf.mxu1 }
0x13ee   :  { %v2082_v53 = vadd.f32 %v3728_v52, %v2079_v50  ;;  %v2173_v54 = vpop.f32.mrf.mxu0 }
0x13ef   :  { %v2178_v55 = vrot.slane %v2173_v54, 2  ;;  %v2549_v54 = vld [vmem:[#allocation4] ss:$0 sm:$0xff] }
0x13f0   :  { %3071 = vtanh.f32 %v2082_v53  ;;  %v2925_v56 = vpop.f32.mrf.mxu0  ;;  %v2543_v29 = vmul.f32 -1.442695, %v2082_v53 }
0x13f1   :  { %v2180_v25 = vadd.f32 %v3267_v8, %v2178_v55 }
0x13f3   :  { %v2181_v26 = vadd.f32 %v3667_v32, %v2180_v25 }
0x13f5   :  { %3073 = vtanh.f32 %v2181_v26  ;;  %v2545_v57 = vmul.f32 -1.442695, %v2181_v26 }
0x13f6   :  { %3075 = vpow2.f32 %v2543_v29 }
0x13f7   :  { %3077 = vpow2.f32 %v2545_v57 }
0x13fd   :  { %v3072_v27 = vpop.eup %3071 }
0x13fe   :  { %2092 = vrot.lane.b32.xlu1 %v3072_v27, %s3159_s13 }
0x1402   :  { %v3074_v28 = vpop.eup %3073 }
0x1403   :  { %2194 = vrot.lane.b32.xlu0 %v3074_v28, %s3159_s13  ;;  %v3076_v30 = vpop.eup %3075 }
0x1404   :  { %v2086_v58 = vadd.f32 1.0, %v3076_v30  ;;  %v3078_v31 = vpop.eup %3077 }
0x1405   :  { %v2185_v60 = vadd.f32 1.0, %v3078_v31 }
0x1406   :  { %3079 = vrcp.f32 %v2086_v58 }
0x1407   :  { %3081 = vrcp.f32 %v2185_v60 }
0x1413   :  { %v3080_v8 = vpop.eup %3079 }
0x1414   :  { %v3082_v59 = vpop.eup %3081  ;;  %v2090_v4 = vmul.f32 %v3080_v8, %v3676_v18 }
0x1415   :  { %v2192_v63 = vmul.f32 %v3082_v59, %v2190_v7 }
0x1470   :  { %v2093_v61 = vpop.permute.xlu1 %2092 }
0x1471   :  { %v2095_v32 = vmul.f32 %v3080_v8, %v2093_v61 }
0x1473   :  { %2097 = vrot.lane.b32.xlu1 %v2095_v32, %s3160_s14 }
0x1475   :  { %v2195_v62 = vpop.permute.xlu0 %2194 }
0x1476   :  { %v2197_v1 = vmul.f32 %v3082_v59, %v2195_v62 }
0x1478   :  { %2199 = vrot.lane.b32.xlu0 %v2197_v1, %s3160_s14 }
0x14e5   :  { %v2098_v39 = vpop.permute.xlu1 %2097 }
0x14e6   :  { %v2100_v6 = vadd.f32 %v2098_v39, %v2090_v4 }
0x14e8   :  { %3083 = vtanh.f32 %v2100_v6 }
0x14ea   :  { %v2200_v2 = vpop.permute.xlu0 %2199 }
0x14eb   :  { %v2202_v3 = vadd.f32 %v2200_v2, %v2192_v63 }
0x14ed   :  { %3085 = vtanh.f32 %v2202_v3 }
0x14f5   :  { %v3084_v5 = vpop.eup %3083 }
0x14f6   :  { %2103 = vrot.lane.b32.xlu1 %v3084_v5, %s3159_s13 }
0x14fa   :  { %v3086_v11 = vpop.eup %3085 }
0x14fb   :  { %2205 = vrot.lane.b32.xlu0 %v3086_v11, %s3159_s13 }
0x1568   :  { %v2104_v12 = vpop.permute.xlu1 %2103 }
0x1569   :  { %v2106_v14 = vmul.f32 %v3080_v8, %v2104_v12 }
0x156b   :  { %v2395_v13 = vrot.slane %v2106_v14, 3  ;;  %2210 = vrot.lane.b32.xlu0 %v2106_v14, %s3160_s14 }
0x156d   :  { %v2206_v15 = vpop.permute.xlu0 %2205  ;;  %v2410_v16 = vsel %vm2409_vm8, %v3686_v35, %v2395_v13 }
0x156e   :  { %v2208_v18 = vmul.f32 %v3082_v59, %v2206_v15 }
0x1570   :  { %v2285_v17 = vrot.slane %v2208_v18, 6 }
0x1572   :  { %2286 = vrot.lane.b32.xlu1 %v2285_v17, %s3160_s14 }
0x15dd   :  { %v2211_v19 = vpop.permute.xlu0 %2210 }
0x15de   :  { %2935 = vmatmul.mubr.msk.f32.vlgmr.msra.gmra.mxu1 %vm161_vm3, %v2211_v19 }
0x15df   :  { %2956 = vmatprep.mubr.msk.f32.mxu1 %vm3158_vm0, %v3157_v0  ;;  %2949 = vmatpush3.msra.mxu1 %v2416_v45 }
0x15e0   :  { %2950 = vmatprep.subr.mxu1 %v3157_v0 }
0x15e1   :  { %2951 = vmatpush3.msra.mxu1 %v2415_v46 }
0x15e2   :  { %2952 = vmatprep.subr.mxu1 %v3157_v0 }
0x15e3   :  { %2953 = vmatpush3.msra.mxu1 %v2414_v9 }
0x15e4   :  { %v2287_v20 = vpop.permute.xlu1 %2286  ;;  %2954 = vmatprep.subr.mxu1 %v3157_v0 }
0x15e5   :  { %2946 = vmatmul.mubr.msk.f32.vlgmr.msra.gmra.mxu0 %vm161_vm3, %v2287_v20  ;;  %2955 = vmatpush3.msra.mxu1 %v2413_v47 }
0x169e   :  { %v2280_v21 = vpop.f32.mrf.mxu1 }
0x16a0   :  { %v2936_v22 = vpop.f32.mrf.mxu1 }
0x16a5   :  { %v2356_v23 = vpop.f32.mrf.mxu0 }
0x16a6   :  { %v2357_v10 = vadd.f32 %v2356_v23, %v2280_v21 }
0x16a7   :  { %v2947_v24 = vpop.f32.mrf.mxu0 }
0x16a8   :  { %v2360_v33 = vadd.f32 %v3728_v52, %v2357_v10 }
0x16aa   :  { %3087 = vtanh.f32 %v2360_v33  ;;  %v2548_v35 = vmul.f32 -1.442695, %v2360_v33 }
0x16ac   :  { %3089 = vpow2.f32 %v2548_v35 }
0x16b7   :  { %v3088_v34 = vpop.eup %3087 }
0x16b8   :  { %2370 = vrot.lane.b32.xlu0 %v3088_v34, %s3159_s13 }
0x16b9   :  { %v3090_v36 = vpop.eup %3089 }
0x16ba   :  { %v2364_v37 = vadd.f32 1.0, %v3090_v36 }
0x16bc   :  { %3091 = vrcp.f32 %v2364_v37 }
0x16c9   :  { %v3092_v38 = vpop.eup %3091 }
0x16ca   :  { %v2368_v42 = vmul.f32 %v3092_v38, %v2100_v6 }
0x172a   :  { %v2371_v40 = vpop.permute.xlu0 %2370 }
0x172b   :  { %v2373_v41 = vmul.f32 %v3092_v38, %v2371_v40 }
0x172d   :  { %2375 = vrot.lane.b32.xlu1 %v2373_v41, %s3160_s14 }
0x179f   :  { %v2376_v43 = vpop.permute.xlu1 %2375 }
0x17a0   :  { %v2378_v44 = vadd.f32 %v2376_v43, %v2368_v42 }
0x17a2   :  { %3093 = vtanh.f32 %v2378_v44 }
0x17af   :  { %v3094_v48 = vpop.eup %3093 }
0x17b0   :  { %2381 = vrot.lane.b32.xlu0 %v3094_v48, %s3159_s13 }
0x1822   :  { %v2382_v49 = vpop.permute.xlu0 %2381 }
0x1823   :  { %v2384_v50 = vmul.f32 %v3092_v38, %v2382_v49 }
0x1825   :  { %v2398_v51 = vrot.slane %v2384_v50, 2 }
0x1827   :  { %v2412_v52 = vsel %vm2411_vm9, %v2410_v16, %v2398_v51 }
0x1828   :  { %2425 = vrot.lane.b32.xlu1 %v2412_v52, %s3160_s14 }
0x189a   :  { %v2426_v53 = vpop.permute.xlu1 %2425 }
0x189b   :  { %2957 = vmatmul.mubr.msk.f32.vlgmr.msra.gmra.mxu1 %vm161_vm3, %v2426_v53 }
0x195b   :  { %v2495_v55 = vpop.f32.mrf.mxu1 }
0x195c   :  { %v2496_v56 = vadd.f32 %v2549_v54, %v2495_v55 }
0x195d   :  { %v2958_v25 = vpop.f32.mrf.mxu1 }
0x195e   :  { %2499 = vst.msk [vmem:[%s3782_s9] sm:$0xff] %vm75_vm2, %v2496_v56 }
0x195f   :  { %2504 = vsyncpa [#allocation3], 1 }
0x1960   :  { %2505 = vsyncpa [#allocation5], 1 }

</bundles_post_ra>
